<compile_context>
chip_gen: v6e
topology: v6e:2x2x1
jax: 0.10.0
libtpu: 0.0.40
codegen_flags: <defaults>
</compile_context>

<pallas_src>
import functools

import jax
import jax.numpy as jnp
from jax import lax
from jax.experimental import pallas as pl
from jax.experimental.pallas import tpu as pltpu

BN_EPS = 1e-3  # matches BatchNorm2d(eps=0.001)


def _fused_add_conv1x1_bn_kernel(a_ref, b_ref, w_ref, g_ref, beta_ref, o_ref,
                                 *, m_total):
    # x480 = x479 + x464 in fp32, cast to bf16 for a native single-pass MXU matmul.
    s = (a_ref[...] + b_ref[...]).astype(jnp.bfloat16)               # [Cin, M]
    # x481 = conv2d(1x1, no bias): y_T = W @ s, fp32 accumulation.
    y = jnp.dot(w_ref[...], s, preferred_element_type=jnp.float32)   # [cb, M]
    # x482 = BatchNorm2d (training-mode batch stats, biased variance) per output
    # channel (= per row).  Two-pass (centered) variance for numerical robustness.
    inv_m = 1.0 / m_total
    mean = jnp.sum(y, axis=-1, keepdims=True) * inv_m                # [cb, 1]
    centered = y - mean
    var = jnp.sum(centered * centered, axis=-1, keepdims=True) * inv_m
    scale = g_ref[...] * lax.rsqrt(var + BN_EPS)                     # [cb, 1]
    o_ref[...] = (centered * scale + beta_ref[...]).astype(o_ref.dtype)


def _pick_cout_blocks(cout, requested):
    """Largest block count <= requested with Cout % n == 0 and (Cout/n) % 8 == 0."""
    for n in range(max(int(requested), 1), 0, -1):
        if cout % n == 0 and (cout // n) % 8 == 0:
            return n
    return 1


def _resident_spec(shape):
    """Constant-index (grid-resident) input: single-buffer it when supported."""
    try:
        return pl.BlockSpec(shape, lambda i: (0, 0), pipeline_mode=pl.Buffered(1))
    except TypeError:  # jax without BlockSpec(pipeline_mode=...)
        return pl.BlockSpec(shape, lambda i: (0, 0))


def fused_forward(x479, x464, conv_weight, bn_gamma, bn_beta, *, n_cout_blocks=6):
    """x479, x464: [N, Cin, H, W]; conv_weight: [Cout, Cin, 1, 1];
    bn_gamma, bn_beta: [Cout].  Returns [N, Cout, H, W]."""
    N, Cin, H, W = x479.shape
    Cout = conv_weight.shape[0]
    M = N * H * W

    # Glue (zero-copy for N == 1): NCHW -> [Cin, M].
    if N == 1:
        a = x479.reshape(Cin, M)
        b = x464.reshape(Cin, M)
    else:
        a = jnp.transpose(x479, (1, 0, 2, 3)).reshape(Cin, M)
        b = jnp.transpose(x464, (1, 0, 2, 3)).reshape(Cin, M)
    # Static weight -> bf16: halves the dominant HBM read and avoids fp32 MXU emulation.
    wmat = conv_weight.reshape(Cout, Cin).astype(jnp.bfloat16)
    g = bn_gamma.reshape(Cout, 1).astype(jnp.float32)
    be = bn_beta.reshape(Cout, 1).astype(jnp.float32)

    n_blk = _pick_cout_blocks(Cout, n_cout_blocks)
    cb = Cout // n_blk

    itemsize = jnp.dtype(x479.dtype).itemsize
    cost = pl.CostEstimate(
        flops=2 * Cout * Cin * M + Cin * M + 5 * Cout * M,
        transcendentals=Cout,  # one rsqrt per output channel
        bytes_accessed=(2 * Cin * M * itemsize        # a + b
                        + Cout * Cin * 2              # bf16 weight
                        + 2 * Cout * 4                # gamma + beta
                        + Cout * M * itemsize),       # output
    )

    out = pl.pallas_call(
        functools.partial(_fused_add_conv1x1_bn_kernel, m_total=float(M)),
        out_shape=jax.ShapeDtypeStruct((Cout, M), x479.dtype),
        grid=(n_blk,),
        in_specs=[
            _resident_spec((Cin, M)),                    # a (resident across grid)
            _resident_spec((Cin, M)),                    # b (resident across grid)
            pl.BlockSpec((cb, Cin), lambda i: (i, 0)),   # W block
            pl.BlockSpec((cb, 1), lambda i: (i, 0)),     # gamma block
            pl.BlockSpec((cb, 1), lambda i: (i, 0)),     # beta block
        ],
        out_specs=pl.BlockSpec((cb, M), lambda i: (i, 0)),
        compiler_params=pltpu.CompilerParams(
            dimension_semantics=("parallel",)),
        cost_estimate=cost,
    )(a, b, wmat, g, be)

    # [Cout, M] -> NCHW (zero-copy reshape for N == 1).
    if N == 1:
        return out.reshape(1, Cout, H, W)
    return jnp.transpose(out.reshape(Cout, N, H, W), (1, 0, 2, 3))


def _reference(x479, x464, conv_weight, bn_gamma, bn_beta):
    s = x479 + x464                                            # [N, Cin, H, W]
    w = conv_weight.reshape(conv_weight.shape[0], -1)          # [Cout, Cin]
    y = jnp.einsum('nchw,oc->nohw', s, w)                      # 1x1 conv, no bias
    mean = jnp.mean(y, axis=(0, 2, 3), keepdims=True)
    var = jnp.mean((y - mean) ** 2, axis=(0, 2, 3), keepdims=True)
    g = bn_gamma.reshape(1, -1, 1, 1)
    be = bn_beta.reshape(1, -1, 1, 1)
    return g * (y - mean) / jnp.sqrt(var + BN_EPS) + be


if __name__ == "__main__":
    # Shapes implied by the module: x479, x464: [1, 200, 14, 14]; conv 200 -> 1200.
    N, Cin, H, W, Cout = 1, 200, 14, 14, 1200

    key = jax.random.PRNGKey(0)
    k1, k2, k3, k4, k5 = jax.random.split(key, 5)
    x479 = jax.random.normal(k1, (N, Cin, H, W), dtype=jnp.float32)
    x464 = jax.random.normal(k2, (N, Cin, H, W), dtype=jnp.float32)
    # Deterministic synthetic parameters (PyTorch shapes: weight [1200, 200, 1, 1]).
    conv_weight = jax.random.normal(k3, (Cout, Cin, 1, 1), dtype=jnp.float32) * 0.05
    bn_gamma = 1.0 + 0.1 * jax.random.normal(k4, (Cout,), dtype=jnp.float32)
    bn_beta = 0.1 * jax.random.normal(k5, (Cout,), dtype=jnp.float32)

    out = fused_forward(x479, x464, conv_weight, bn_gamma, bn_beta)
    out = jax.block_until_ready(out)

    ref = _reference(x479, x464, conv_weight, bn_gamma, bn_beta)
    assert out.shape == (N, Cout, H, W), out.shape
    max_err = float(jnp.max(jnp.abs(out - ref)))
    # Tolerance deliberately loosened for the bf16 MXU operands (fp32 accumulate,
    # fp32 BN statistics); the fp32 reference differs at the ~1e-2 level.
    assert jnp.allclose(out, ref, atol=3e-2, rtol=3e-2), max_err

    # TODO(synk): PyTorch training-mode BN also updates running_mean/running_var
    # (momentum=0.01); this forward-only kernel does not emulate that state update.
    print("KERNEL_OK")
</pallas_src>

<mosaic_0001>
module attributes {stable_mosaic.version = 11 : i64} {
  func.func @_fused_add_conv1x1_bn_kernel(%arg0: i32, %arg1: memref<200x196xf32, #tpu.memory_space<vmem>>, %arg2: memref<200x196xf32, #tpu.memory_space<vmem>>, %arg3: memref<200x200xbf16, #tpu.memory_space<vmem>>, %arg4: memref<200x1xf32, #tpu.memory_space<vmem>>, %arg5: memref<200x1xf32, #tpu.memory_space<vmem>>, %arg6: memref<200x196xf32, #tpu.memory_space<vmem>>) attributes {dimension_semantics = [#tpu.dimension_semantics<parallel>], iteration_bounds = array<i64: 6>, scalar_prefetch = 0 : i64, scratch_operands = 0 : i64, tpu.core_type = #tpu.core_type<tc>, window_params = [{pipeline_mode = #tpu.pipeline_mode<synchronous>, transform_indices = @transform_0, window_bounds = array<i64: 200, 196>}, {pipeline_mode = #tpu.pipeline_mode<synchronous>, transform_indices = @transform_1, window_bounds = array<i64: 200, 196>}, {transform_indices = @transform_2, window_bounds = array<i64: 200, 200>}, {transform_indices = @transform_3, window_bounds = array<i64: 200, 1>}, {transform_indices = @transform_4, window_bounds = array<i64: 200, 1>}, {transform_indices = @transform_5, window_bounds = array<i64: 200, 196>}]} {
    %c0 = arith.constant 0 : index
    %c0_0 = arith.constant 0 : index
    %0 = vector.load %arg1[%c0, %c0_0] : memref<200x196xf32, #tpu.memory_space<vmem>>, vector<200x196xf32>
    %c0_1 = arith.constant 0 : index
    %c0_2 = arith.constant 0 : index
    %1 = vector.load %arg2[%c0_1, %c0_2] : memref<200x196xf32, #tpu.memory_space<vmem>>, vector<200x196xf32>
    %2 = arith.addf %0, %1 : vector<200x196xf32>
    %3 = arith.truncf %2 : vector<200x196xf32> to vector<200x196xbf16>
    %c0_3 = arith.constant 0 : index
    %c0_4 = arith.constant 0 : index
    %4 = vector.load %arg3[%c0_3, %c0_4] : memref<200x200xbf16, #tpu.memory_space<vmem>>, vector<200x200xbf16>
    %cst = arith.constant dense<0.000000e+00> : vector<200x196xf32>
    %5 = tpu.matmul %4, %3, %cst {dimension_numbers = #tpu.dot_dimension_numbers<[1], [0], [0], [1], [0, 0, 1, 1], [], []>} : vector<200x200xbf16>, vector<200x196xbf16>, vector<200x196xf32> -> vector<200x196xf32>
    %cst_5 = arith.constant dense<0.000000e+00> : vector<200xf32>
    %6 = vector.multi_reduction <add>, %5, %cst_5 [1] : vector<200x196xf32> to vector<200xf32>
    %7 = vector.shape_cast %6 : vector<200xf32> to vector<200x1xf32>
    %cst_6 = arith.constant 0.00510204071 : f32
    %8 = vector.broadcast %cst_6 : f32 to vector<200x1xf32>
    %9 = arith.mulf %7, %8 : vector<200x1xf32>
    %10 = vector.broadcast %9 : vector<200x1xf32> to vector<200x196xf32>
    %11 = arith.subf %5, %10 : vector<200x196xf32>
    %12 = arith.mulf %11, %11 : vector<200x196xf32>
    %cst_7 = arith.constant dense<0.000000e+00> : vector<200xf32>
    %13 = vector.multi_reduction <add>, %12, %cst_7 [1] : vector<200x196xf32> to vector<200xf32>
    %14 = vector.shape_cast %13 : vector<200xf32> to vector<200x1xf32>
    %cst_8 = arith.constant 0.00510204071 : f32
    %15 = vector.broadcast %cst_8 : f32 to vector<200x1xf32>
    %16 = arith.mulf %14, %15 : vector<200x1xf32>
    %c0_9 = arith.constant 0 : index
    %c0_10 = arith.constant 0 : index
    %17 = vector.load %arg4[%c0_9, %c0_10] : memref<200x1xf32, #tpu.memory_space<vmem>>, vector<200x1xf32>
    %cst_11 = arith.constant 1.000000e-03 : f32
    %18 = vector.broadcast %cst_11 : f32 to vector<200x1xf32>
    %19 = arith.addf %16, %18 : vector<200x1xf32>
    %20 = math.rsqrt %19 : vector<200x1xf32>
    %21 = arith.mulf %17, %20 : vector<200x1xf32>
    %22 = vector.broadcast %21 : vector<200x1xf32> to vector<200x196xf32>
    %23 = arith.mulf %11, %22 : vector<200x196xf32>
    %c0_12 = arith.constant 0 : index
    %c0_13 = arith.constant 0 : index
    %24 = vector.load %arg5[%c0_12, %c0_13] : memref<200x1xf32, #tpu.memory_space<vmem>>, vector<200x1xf32>
    %25 = vector.broadcast %24 : vector<200x1xf32> to vector<200x196xf32>
    %26 = arith.addf %23, %25 : vector<200x196xf32>
    %c0_14 = arith.constant 0 : index
    %c0_15 = arith.constant 0 : index
    %27 = vector.load %arg6[%c0_14, %c0_15] : memref<200x196xf32, #tpu.memory_space<vmem>>, vector<200x196xf32>
    tpu.vector_store %arg6[%c0_14, %c0_15], %26 {strides = array<i32>} : memref<200x196xf32, #tpu.memory_space<vmem>>, vector<200x196xf32>,
    return
  }
  func.func @transform_0(%arg0: i32) -> (i32, i32) {
    %c0_i32 = arith.constant 0 : i32
    %c0_i32_0 = arith.constant 0 : i32
    %c0_i32_1 = arith.constant 0 : i32
    return %c0_i32, %c0_i32_0 : i32, i32
  }
  func.func @transform_1(%arg0: i32) -> (i32, i32) {
    %c0_i32 = arith.constant 0 : i32
    %c0_i32_0 = arith.constant 0 : i32
    %c0_i32_1 = arith.constant 0 : i32
    return %c0_i32, %c0_i32_0 : i32, i32
  }
  func.func @transform_2(%arg0: i32) -> (i32, i32) {
    %c0_i32 = arith.constant 0 : i32
    %c0_i32_0 = arith.constant 0 : i32
    return %arg0, %c0_i32 : i32, i32
  }
  func.func @transform_3(%arg0: i32) -> (i32, i32) {
    %c0_i32 = arith.constant 0 : i32
    %c0_i32_0 = arith.constant 0 : i32
    return %arg0, %c0_i32 : i32, i32
  }
  func.func @transform_4(%arg0: i32) -> (i32, i32) {
    %c0_i32 = arith.constant 0 : i32
    %c0_i32_0 = arith.constant 0 : i32
    return %arg0, %c0_i32 : i32, i32
  }
  func.func @transform_5(%arg0: i32) -> (i32, i32) {
    %c0_i32 = arith.constant 0 : i32
    %c0_i32_0 = arith.constant 0 : i32
    return %arg0, %c0_i32 : i32, i32
  }
}

</mosaic_0001>

<bundles_post_ra>
// kernel: tpu_custom_call.1
= control target key start
LH: loop header
LB: loop body
LE: loop exit
PB: predicated region body
PF: predicated region fallthrough
CT: control target
= control target key end

     0   :  { %s1978_s18 = smov 0   ;;  %s3068_s0 = inlined_call_operand.vmem [shape: f32[200,196], index: 0, kind: input, shape index: {}]   ;;  %s3069_s1 = inlined_call_operand.vmem [shape: f32[200,196], index: 1, kind: input, shape index: {}]   ;;  %s3070_s2 = inlined_call_operand.vmem [shape: bf16[1200,200], index: 2, kind: input, shape index: {}]   ;;  %s3071_s3 = inlined_call_operand.vmem [shape: f32[1200,1], index: 3, kind: input, shape index: {}]   ;;  %s3072_s4 = inlined_call_operand.vmem [shape: f32[1200,1], index: 4, kind: input, shape index: {}]   ;;  %s3073_s5 = inlined_call_operand.vmem [shape: f32[1200,196], index: 5, kind: output, shape index: {}]  }
   0x1 LB: > { %s1759_s19 = sadd.s32 4294967295, %s1945_s18   ;;  %p1763_p0 = scmp.ge.s32.totalorder %s1945_s18, 1  ;;  %s1945_s18 = sphi %s1978_s18, %s15_s18  }
   0x2   : > { %p211_p1 = scmp.lt.s32.totalorder %s1945_s18, 7 }
   0x4   : > { %p212_p2 = pnand %p1763_p0, %p211_p1 }
   0x6   : > { %215 = sbr.rel (%p212_p2) target bundleno = 800 (0x320), region = 40 }
   0xb   : > { %v307_v0 = vld [vmem:[%s3068_s0 + $0xe8] sm:$0xff]  ;;  %v309_v1 = vld [vmem:[%s3068_s0 + $0xf8] sm:$0xff]  ;;  %v306_v5 = vld [vmem:[%s3068_s0 + $0xe0] sm:$0xff]  ;;  %v1947_v11 = vmov 0   ;;  %s2135_s26 = smul.u32 25, %s1759_s19  ;;  %vm633_vm0 = vcmask 1043456  }
   0xc   : > { %v357_v2 = vld [vmem:[%s3069_s1 + $0xe8] sm:$0xff]  ;;  %v359_v3 = vld [vmem:[%s3069_s1 + $0xf8] sm:$0xff]  ;;  %v308_v6 = vld [vmem:[%s3068_s0 + $0xf0] sm:$0xff]  ;;  %1850 = vset.pattern.permute.xlu1 %v1947_v11  ;;  %1849 = vset.pattern.permute.xlu0 %v1947_v11  ;;  %vm593_vm1 = vcmask 588800   ;;  %vm801_vm2 = vcmask 556032  }
   0xd   : > { %v407_v4 = vadd.f32 %v357_v2, %v307_v0  ;;  %v409_v7 = vadd.f32 %v359_v3, %v309_v1  ;;  %v356_v8 = vld [vmem:[%s3069_s1 + $0xe0] sm:$0xff]  ;;  %v358_v9 = vld [vmem:[%s3069_s1 + $0xf0] sm:$0xff]  ;;  %v303_v10 = vld [vmem:[%s3068_s0 + $0xc8] sm:$0xff]  ;;  %p252_p3 = scmp.lt.s32.totalorder %s2135_s26, 149 }
   0xe   : > { %v406_v12 = vadd.f32 %v356_v8, %v306_v5  ;;  %v408_v13 = vadd.f32 %v358_v9, %v308_v6  ;;  %v305_v14 = vld [vmem:[%s3068_s0 + $0xd8] sm:$0xff]  ;;  %v353_v15 = vld [vmem:[%s3069_s1 + $0xc8] sm:$0xff]  ;;  %v302_v20 = vld [vmem:[%s3068_s0 + $0xc0] sm:$0xff] }
   0xf   : > { %v355_v16 = vld [vmem:[%s3069_s1 + $0xd8] sm:$0xff]  ;;  %v443_v17 = vpack.c.bf16 %v409_v7, %v407_v4  ;;  %v403_v18 = vadd.f32 %v353_v15, %v303_v10  ;;  %v304_v21 = vld [vmem:[%s3068_s0 + $0xd0] sm:$0xff]  ;;  %v352_v22 = vld [vmem:[%s3069_s1 + $0xc0] sm:$0xff]  ;;  %s3138_s26 = smov (!%p252_p3, %s2135_s26), 149 }
  0x10   : > { %v405_v19 = vadd.f32 %v355_v16, %v305_v14  ;;  %v442_v23 = vpack.c.bf16 %v408_v13, %v406_v12  ;;  %v354_v24 = vld [vmem:[%s3069_s1 + $0xd0] sm:$0xff]  ;;  %v402_v25 = vadd.f32 %v352_v22, %v302_v20  ;;  %v299_v26 = vld [vmem:[%s3068_s0 + $0xa8] sm:$0xff]  ;;  %v301_v27 = vld [vmem:[%s3068_s0 + $0xb8] sm:$0xff]  ;;  %s2204_s20 = sshll.u32 %s3138_s26, 3 }
  0x11   : > { %640 = vmatprep.subr.bf16.mxu0 %v443_v17  ;;  %1814 = vmatprep.subr.bf16.mxu1 %v443_v17  ;;  %v404_v29 = vadd.f32 %v354_v24, %v304_v21  ;;  %v349_v30 = vld [vmem:[%s3069_s1 + $0xa8] sm:$0xff]  ;;  %v351_v31 = vld [vmem:[%s3069_s1 + $0xb8] sm:$0xff]  ;;  %v298_v32 = vld [vmem:[%s3068_s0 + $0xa0] sm:$0xff]  ;;  %s2231_s12 = scalar_lea.vmem %s3070_s2, %s2204_s20  ;;  %s2316_s24 = scalar_lea.vmem %s3072_s4, %s2204_s20 }
  0x12   : > { %v441_v28 = vpack.c.bf16 %v405_v19, %v403_v18  ;;  %641 = vmatpush1.bf16.msra.mxu0 %v442_v23  ;;  %1827 = vmatpush1.bf16.msra.mxu1 %v442_v23  ;;  %v399_v33 = vadd.f32 %v349_v30, %v299_v26  ;;  %v401_v34 = vadd.f32 %v351_v31, %v301_v27  ;;  %v300_v35 = vld [vmem:[%s3068_s0 + $0xb0] sm:$0xff]  ;;  %v348_v36 = vld [vmem:[%s3069_s1 + $0xa0] sm:$0xff]  ;;  %v295_v41 = vld [vmem:[%s3068_s0 + $0x88] sm:$0xff]  ;;  %s2849_s27 = scalar_lea.vmem %s3071_s3, %s2204_s20  ;;  %s1813_s20 = sshll.u32 %s3138_s26, 4 }
  0x13   : > { %v350_v37 = vld [vmem:[%s3069_s1 + $0xb0] sm:$0xff]  ;;  %v440_v38 = vpack.c.bf16 %v404_v29, %v402_v25  ;;  %v398_v39 = vadd.f32 %v348_v36, %v298_v32  ;;  %v297_v42 = vld [vmem:[%s3068_s0 + $0x98] sm:$0xff]  ;;  %v345_v43 = vld [vmem:[%s3069_s1 + $0x88] sm:$0xff]  ;;  %s2902_s30 = scalar_lea.vmem %s3073_s5, %s1813_s20 }
  0x14   : > { %642 = vmatprep.subr.bf16.mxu0 %v441_v28  ;;  %1815 = vmatprep.subr.bf16.mxu1 %v441_v28  ;;  %v400_v40 = vadd.f32 %v350_v37, %v300_v35  ;;  %v439_v44 = vpack.c.bf16 %v401_v34, %v399_v33  ;;  %v347_v45 = vld [vmem:[%s3069_s1 + $0x98] sm:$0xff]  ;;  %v395_v46 = vadd.f32 %v345_v43, %v295_v41  ;;  %v294_v47 = vld [vmem:[%s3068_s0 + $0x80] sm:$0xff]  ;;  %v296_v48 = vld [vmem:[%s3068_s0 + $0x90] sm:$0xff] }
  0x15   : > { %v397_v49 = vadd.f32 %v347_v45, %v297_v42  ;;  %v344_v50 = vld [vmem:[%s3069_s1 + $0x80] sm:$0xff]  ;;  %v346_v51 = vld [vmem:[%s3069_s1 + $0x90] sm:$0xff]  ;;  %v291_v52 = vld [vmem:[%s3068_s0 + $0x68] sm:$0xff] }
  0x16   : > { %643 = vmatpush1.bf16.msra.mxu0 %v440_v38  ;;  %1828 = vmatpush1.bf16.msra.mxu1 %v440_v38  ;;  %v438_v53 = vpack.c.bf16 %v400_v40, %v398_v39  ;;  %v394_v54 = vadd.f32 %v344_v50, %v294_v47  ;;  %v396_v55 = vadd.f32 %v346_v51, %v296_v48  ;;  %v293_v56 = vld [vmem:[%s3068_s0 + $0x78] sm:$0xff]  ;;  %v341_v57 = vld [vmem:[%s3069_s1 + $0x68] sm:$0xff]  ;;  %v290_v62 = vld [vmem:[%s3068_s0 + $0x60] sm:$0xff] }
  0x17   : > { %v343_v58 = vld [vmem:[%s3069_s1 + $0x78] sm:$0xff]  ;;  %644 = vmatprep.subr.bf16.mxu0 %v439_v44  ;;  %1816 = vmatprep.subr.bf16.mxu1 %v439_v44  ;;  %v437_v59 = vpack.c.bf16 %v397_v49, %v395_v46  ;;  %v391_v60 = vadd.f32 %v341_v57, %v291_v52  ;;  %v292_v63 = vld [vmem:[%s3068_s0 + $0x70] sm:$0xff]  ;;  %v340_v0 = vld [vmem:[%s3069_s1 + $0x60] sm:$0xff] }
  0x18   : > { %v393_v61 = vadd.f32 %v343_v58, %v293_v56  ;;  %v342_v1 = vld [vmem:[%s3069_s1 + $0x70] sm:$0xff]  ;;  %v287_v2 = vld [vmem:[%s3068_s0 + $0x48] sm:$0xff]  ;;  %v289_v3 = vld [vmem:[%s3068_s0 + $0x58] sm:$0xff]  ;;  %v436_v6 = vpack.c.bf16 %v396_v55, %v394_v54  ;;  %v390_v7 = vadd.f32 %v340_v0, %v290_v62 }
  0x19   : > { %v337_v4 = vld [vmem:[%s3069_s1 + $0x48] sm:$0xff]  ;;  %v339_v5 = vld [vmem:[%s3069_s1 + $0x58] sm:$0xff]  ;;  %v392_v8 = vadd.f32 %v342_v1, %v292_v63  ;;  %v286_v9 = vld [vmem:[%s3068_s0 + $0x40] sm:$0xff] }
  0x1a   : > { %645 = vmatpush1.bf16.msra.mxu0 %v438_v53  ;;  %1829 = vmatpush1.bf16.msra.mxu1 %v438_v53  ;;  %v288_v10 = vld [vmem:[%s3068_s0 + $0x50] sm:$0xff]  ;;  %v435_v11 = vpack.c.bf16 %v393_v61, %v391_v60  ;;  %v387_v12 = vadd.f32 %v337_v4, %v287_v2  ;;  %v389_v13 = vadd.f32 %v339_v5, %v289_v3  ;;  %v336_v14 = vld [vmem:[%s3069_s1 + $0x40] sm:$0xff]  ;;  %v283_v16 = vld [vmem:[%s3068_s0 + $0x28] sm:$0xff] }
  0x1b   : > { %646 = vmatprep.subr.bf16.mxu0 %v437_v59  ;;  %1817 = vmatprep.subr.bf16.mxu1 %v437_v59  ;;  %v338_v15 = vld [vmem:[%s3069_s1 + $0x50] sm:$0xff]  ;;  %v285_v17 = vld [vmem:[%s3068_s0 + $0x38] sm:$0xff]  ;;  %v333_v18 = vld [vmem:[%s3069_s1 + $0x28] sm:$0xff]  ;;  %v434_v21 = vpack.c.bf16 %v392_v8, %v390_v7  ;;  %v386_v22 = vadd.f32 %v336_v14, %v286_v9 }
  0x1c   : > { %v335_v19 = vld [vmem:[%s3069_s1 + $0x38] sm:$0xff]  ;;  %v282_v20 = vld [vmem:[%s3068_s0 + $0x20] sm:$0xff]  ;;  %v388_v23 = vadd.f32 %v338_v15, %v288_v10  ;;  %v284_v24 = vld [vmem:[%s3068_s0 + $0x30] sm:$0xff]  ;;  %v433_v27 = vpack.c.bf16 %v389_v13, %v387_v12  ;;  %v383_v28 = vadd.f32 %v333_v18, %v283_v16 }
  0x1d   : > { %v332_v25 = vld [vmem:[%s3069_s1 + $0x20] sm:$0xff]  ;;  %v334_v26 = vld [vmem:[%s3069_s1 + $0x30] sm:$0xff]  ;;  %v385_v29 = vadd.f32 %v335_v19, %v285_v17  ;;  %v279_v30 = vld [vmem:[%s3068_s0 + $0x8] sm:$0xff] }
  0x1e   : > { %647 = vmatpush1.bf16.msra.mxu0 %v436_v6  ;;  %1830 = vmatpush1.bf16.msra.mxu1 %v436_v6  ;;  %v281_v31 = vld [vmem:[%s3068_s0 + $0x18] sm:$0xff]  ;;  %v329_v32 = vld [vmem:[%s3069_s1 + $0x8] sm:$0xff]  ;;  %v382_v34 = vadd.f32 %v332_v25, %v282_v20  ;;  %v384_v35 = vadd.f32 %v334_v26, %v284_v24  ;;  %v432_v36 = vpack.c.bf16 %v388_v23, %v386_v22  ;;  %v278_v37 = vld [vmem:[%s3068_s0] sm:$0xff] }
  0x1f   : > { %648 = vmatprep.subr.bf16.mxu0 %v435_v11  ;;  %1818 = vmatprep.subr.bf16.mxu1 %v435_v11  ;;  %v331_v33 = vld [vmem:[%s3069_s1 + $0x18] sm:$0xff]  ;;  %v280_v38 = vld [vmem:[%s3068_s0 + $0x10] sm:$0xff]  ;;  %v328_v39 = vld [vmem:[%s3069_s1] sm:$0xff]  ;;  %v431_v40 = vpack.c.bf16 %v385_v29, %v383_v28  ;;  %v379_v41 = vadd.f32 %v329_v32, %v279_v30 }
  0x20   : > { %v381_v42 = vadd.f32 %v331_v33, %v281_v31  ;;  %v330_v43 = vld [vmem:[%s3069_s1 + $0x10] sm:$0xff]  ;;  %v327_v44 = vld [vmem:[%s3068_s0 + $0x188] sm:$0xff]  ;;  %v326_v46 = vld [vmem:[%s3068_s0 + $0x180] sm:$0xff]  ;;  %v430_v48 = vpack.c.bf16 %v384_v35, %v382_v34  ;;  %v378_v49 = vadd.f32 %v328_v39, %v278_v37 }
  0x21   : > { %v377_v45 = vld [vmem:[%s3069_s1 + $0x188] sm:$0xff]  ;;  %v376_v47 = vld [vmem:[%s3069_s1 + $0x180] sm:$0xff]  ;;  %v380_v50 = vadd.f32 %v330_v43, %v280_v38  ;;  %v325_v55 = vld [vmem:[%s3068_s0 + $0x178] sm:$0xff] }
  0x22   : > { %649 = vmatpush1.bf16.msra.mxu0 %v434_v21  ;;  %1831 = vmatpush1.bf16.msra.mxu1 %v434_v21  ;;  %v427_v51 = vadd.f32 %v377_v45, %v327_v44  ;;  %v429_v52 = vpack.c.bf16 %v381_v42, %v379_v41  ;;  %v426_v53 = vadd.f32 %v376_v47, %v326_v46  ;;  %v323_v54 = vld [vmem:[%s3068_s0 + $0x168] sm:$0xff]  ;;  %v375_v57 = vld [vmem:[%s3069_s1 + $0x178] sm:$0xff]  ;;  %v322_v58 = vld [vmem:[%s3068_s0 + $0x160] sm:$0xff] }
  0x23   : > { %650 = vmatprep.subr.bf16.mxu0 %v433_v27  ;;  %1819 = vmatprep.subr.bf16.mxu1 %v433_v27  ;;  %v373_v56 = vld [vmem:[%s3069_s1 + $0x168] sm:$0xff]  ;;  %v428_v59 = vpack.c.bf16 %v380_v50, %v378_v49  ;;  %v324_v61 = vld [vmem:[%s3068_s0 + $0x170] sm:$0xff]  ;;  %v372_v62 = vld [vmem:[%s3069_s1 + $0x160] sm:$0xff]  ;;  %v425_v2 = vadd.f32 %v375_v57, %v325_v55 }
  0x24   : > { %v453_v60 = vpack.c.bf16 %v427_v51, %v427_v51  ;;  %v374_v63 = vld [vmem:[%s3069_s1 + $0x170] sm:$0xff]  ;;  %v452_v0 = vpack.c.bf16 %v426_v53, %v426_v53  ;;  %v423_v1 = vadd.f32 %v373_v56, %v323_v54  ;;  %v319_v3 = vld [vmem:[%s3068_s0 + $0x148] sm:$0xff]  ;;  %v321_v4 = vld [vmem:[%s3068_s0 + $0x158] sm:$0xff]  ;;  %v422_v12 = vadd.f32 %v372_v62, %v322_v58 }
  0x25   : > { %v369_v5 = vld [vmem:[%s3069_s1 + $0x148] sm:$0xff]  ;;  %v371_v6 = vld [vmem:[%s3069_s1 + $0x158] sm:$0xff]  ;;  %v318_v7 = vld [vmem:[%s3068_s0 + $0x140] sm:$0xff]  ;;  %v424_v13 = vadd.f32 %v374_v63, %v324_v61 }
  0x26   : > { %651 = vmatpush1.bf16.msra.mxu0 %v432_v36  ;;  %1832 = vmatpush1.bf16.msra.mxu1 %v432_v36  ;;  %v320_v8 = vld [vmem:[%s3068_s0 + $0x150] sm:$0xff]  ;;  %v368_v9 = vld [vmem:[%s3069_s1 + $0x140] sm:$0xff]  ;;  %v315_v14 = vld [vmem:[%s3068_s0 + $0x128] sm:$0xff]  ;;  %v635_v17 = vsel %vm633_vm0, %v452_v0, 0  ;;  %v451_v18 = vpack.c.bf16 %v425_v2, %v423_v1  ;;  %v419_v19 = vadd.f32 %v369_v5, %v319_v3  ;;  %v421_v20 = vadd.f32 %v371_v6, %v321_v4 }
  0x27   : > { %652 = vmatprep.subr.bf16.mxu0 %v431_v40  ;;  %1820 = vmatprep.subr.bf16.mxu1 %v431_v40  ;;  %v370_v10 = vld [vmem:[%s3069_s1 + $0x150] sm:$0xff]  ;;  %v1853_v11 = vld [vmem:[%s2231_s12 + $0x4] ss:$8 sps:$4 sm:$0xff]   ;;  %v317_v15 = vld [vmem:[%s3068_s0 + $0x138] sm:$0xff]  ;;  %v450_v27 = vpack.c.bf16 %v424_v13, %v422_v12  ;;  %v418_v28 = vadd.f32 %v368_v9, %v318_v7 }
  0x28   : > { %v1856_v16 = vld [vmem:[%s2231_s12 + $0x74] ss:$8 sps:$4 sm:$0xff]   ;;  %v365_v21 = vld [vmem:[%s3069_s1 + $0x128] sm:$0xff]  ;;  %1797 = vmatprep.mubr.msk.bf16.mxu0 %vm593_vm1, %v1853_v11  ;;  %v314_v23 = vld [vmem:[%s3068_s0 + $0x120] sm:$0xff]  ;;  %v420_v29 = vadd.f32 %v370_v10, %v320_v8  ;;  %v449_v31 = vpack.c.bf16 %v421_v20, %v419_v19 }
  0x29   : > { %v367_v22 = vld [vmem:[%s3069_s1 + $0x138] sm:$0xff]  ;;  %1804 = vmatprep.mubr.msk.bf16.mxu1 %vm593_vm1, %v1856_v16  ;;  %v316_v24 = vld [vmem:[%s3068_s0 + $0x130] sm:$0xff]  ;;  %v364_v25 = vld [vmem:[%s3069_s1 + $0x120] sm:$0xff]  ;;  %v415_v32 = vadd.f32 %v365_v21, %v315_v14 }
  0x2a   : > { %653 = vmatpush1.bf16.msra.mxu0 %v430_v48  ;;  %1833 = vmatpush1.bf16.msra.mxu1 %v430_v48  ;;  %v366_v26 = vld [vmem:[%s3069_s1 + $0x130] sm:$0xff]  ;;  %v311_v30 = vld [vmem:[%s3068_s0 + $0x108] sm:$0xff]  ;;  %v417_v33 = vadd.f32 %v367_v22, %v317_v15  ;;  %v313_v34 = vld [vmem:[%s3068_s0 + $0x118] sm:$0xff]  ;;  %v448_v37 = vpack.c.bf16 %v420_v29, %v418_v28  ;;  %v414_v38 = vadd.f32 %v364_v25, %v314_v23 }
  0x2b   : > { %654 = vmatprep.subr.bf16.mxu0 %v429_v52  ;;  %1821 = vmatprep.subr.bf16.mxu1 %v429_v52  ;;  %v361_v35 = vld [vmem:[%s3069_s1 + $0x108] sm:$0xff]  ;;  %v363_v36 = vld [vmem:[%s3069_s1 + $0x118] sm:$0xff]  ;;  %v416_v39 = vadd.f32 %v366_v26, %v316_v24  ;;  %v310_v40 = vld [vmem:[%s3068_s0 + $0x100] sm:$0xff] }
  0x2c   : > { %v312_v41 = vld [vmem:[%s3068_s0 + $0x110] sm:$0xff]  ;;  %v360_v42 = vld [vmem:[%s3069_s1 + $0x100] sm:$0xff]  ;;  %v447_v43 = vpack.c.bf16 %v417_v33, %v415_v32  ;;  %v411_v44 = vadd.f32 %v361_v35, %v311_v30  ;;  %v413_v45 = vadd.f32 %v363_v36, %v313_v34  ;;  %v1428_v51 = vld [vmem:[%s2316_s24 + $0x8] sm:$0xff] }
  0x2d   : > { %v362_v46 = vld [vmem:[%s3069_s1 + $0x110] sm:$0xff]  ;;  %v446_v47 = vpack.c.bf16 %v416_v39, %v414_v38  ;;  %v410_v48 = vadd.f32 %v360_v42, %v310_v40  ;;  %1459 = vperm.xlu1 %1850, %v1428_v51   ;;  %v1430_v53 = vld [vmem:[%s2316_s24 + $0x18] sm:$0xff]  ;;  %v1427_v54 = vld [vmem:[%s2316_s24] sm:$0xff] }
  0x2e   : > { %655 = vmatpush1.bf16.msra.mxu0 %v428_v59  ;;  %1834 = vmatpush1.bf16.msra.mxu1 %v428_v59  ;;  %v412_v49 = vadd.f32 %v362_v46, %v312_v41  ;;  %v445_v50 = vpack.c.bf16 %v413_v45, %v411_v44  ;;  %v1851_v55 = vld [vmem:[%s2231_s12] ss:$8 sps:$4 sm:$0xff]   ;;  %v1854_v56 = vld [vmem:[%s2231_s12 + $0x70] ss:$8 sps:$4 sm:$0xff]   ;;  %v1857_v58 = vld [vmem:[%s2231_s12 + $0x14] ss:$8 sps:$4 sm:$0xff]  }
  0x2f   : > { %1796 = vmatprep.subr.msk.bf16.mxu0 %vm633_vm0, %v453_v60  ;;  %1822 = vmatprep.subr.msk.bf16.mxu1 %vm633_vm0, %v453_v60  ;;  %v1429_v57 = vld [vmem:[%s2316_s24 + $0x10] sm:$0xff]  ;;  %v1859_v59 = vld [vmem:[%s2231_s12 + $0x84] ss:$8 sps:$4 sm:$0xff]   ;;  %v1434_v62 = vld [vmem:[%s2316_s24 + $0x38] sm:$0xff] }
  0x30   : > { %v444_v52 = vpack.c.bf16 %v412_v49, %v410_v48  ;;  %1454 = vperm.xlu0 %1849, %v1427_v54   ;;  %v1432_v60 = vld [vmem:[%s2316_s24 + $0x28] sm:$0xff]  ;;  %v1431_v61 = vld [vmem:[%s2316_s24 + $0x20] sm:$0xff]  ;;  %v1861_v63 = vld [vmem:[%s2231_s12 + $0x10] ss:$8 sps:$4 sm:$0xff]  }
  0x31   : > { %1469 = vperm.xlu1 %1850, %v1430_v53   ;;  %v1862_v0 = vld [vmem:[%s2231_s12 + $0x80] ss:$8 sps:$4 sm:$0xff]   ;;  %v1433_v1 = vld [vmem:[%s2316_s24 + $0x30] sm:$0xff]  ;;  %v1863_v2 = vld [vmem:[%s2231_s12 + $0x24] ss:$8 sps:$4 sm:$0xff]  }
  0x32   : > { %663 = vmatpush2.bf16.msra.mxu0 %v635_v17  ;;  %1835 = vmatpush2.bf16.msra.mxu1 %v635_v17  ;;  %v1865_v3 = vld [vmem:[%s2231_s12 + $0x94] ss:$8 sps:$4 sm:$0xff]   ;;  %v1867_v4 = vld [vmem:[%s2231_s12 + $0x20] ss:$8 sps:$4 sm:$0xff]   ;;  %v1868_v5 = vld [vmem:[%s2231_s12 + $0x90] ss:$8 sps:$4 sm:$0xff]  }
  0x33   : > { %664 = vmatprep.subr.bf16.mxu0 %v451_v18  ;;  %1823 = vmatprep.subr.bf16.mxu1 %v451_v18  ;;  %v1869_v6 = vld [vmem:[%s2231_s12 + $0x34] ss:$8 sps:$4 sm:$0xff]   ;;  %v1871_v7 = vld [vmem:[%s2231_s12 + $0xa4] ss:$8 sps:$4 sm:$0xff]   ;;  %v1873_v8 = vld [vmem:[%s2231_s12 + $0x30] ss:$8 sps:$4 sm:$0xff]  }
  0x34   : > { %1464 = vperm.xlu0 %1849, %v1429_v57   ;;  %v1874_v9 = vld [vmem:[%s2231_s12 + $0xa0] ss:$8 sps:$4 sm:$0xff]   ;;  %v1875_v10 = vld [vmem:[%s2231_s12 + $0x44] ss:$8 sps:$4 sm:$0xff]   ;;  %v1877_v11 = vld [vmem:[%s2231_s12 + $0xb4] ss:$8 sps:$4 sm:$0xff]  }
  0x35   : > { %1479 = vperm.xlu1 %1850, %v1432_v60   ;;  %v478_v12 = vld [vmem:[%s2231_s12 + $0xc0] sm:$0xff]  ;;  %v1880_v14 = vld [vmem:[%s2231_s12 + $0xb0] ss:$8 sps:$4 sm:$0xff]   ;;  %v1881_v15 = vld [vmem:[%s2231_s12 + $0x54] ss:$8 sps:$4 sm:$0xff]  }
  0x36   : > { %665 = vmatpush2.bf16.msra.mxu0 %v450_v27  ;;  %1836 = vmatpush2.bf16.msra.mxu1 %v450_v27  ;;  %v1879_v13 = vld [vmem:[%s2231_s12 + $0x40] ss:$8 sps:$4 sm:$0xff]   ;;  %v1795_v16 = vcombine.high %v478_v12, %v478_v12  ;;  %v1883_v17 = vld [vmem:[%s2231_s12 + $0x50] ss:$8 sps:$4 sm:$0xff]   ;;  %v1794_v18 = vcombine.low %v478_v12, %v478_v12  ;;  %v1886_v19 = vld [vmem:[%s2231_s12 + $0x64] ss:$8 sps:$4 sm:$0xff]  }
  0x37   : > { %666 = vmatprep.subr.bf16.mxu0 %v449_v31  ;;  %1824 = vmatprep.subr.bf16.mxu1 %v449_v31  ;;  %v1888_v20 = vld [vmem:[%s2231_s12 + $0x60] ss:$8 sps:$4 sm:$0xff]  }
  0x38   : > { %1474 = vperm.xlu0 %1849, %v1431_v61  }
  0x39   : > { %1489 = vperm.xlu1 %1850, %v1434_v62  }
  0x3a   : > { %667 = vmatpush2.bf16.msra.mxu0 %v448_v37  ;;  %1837 = vmatpush2.bf16.msra.mxu1 %v448_v37 }
  0x3b   : > { %668 = vmatprep.subr.bf16.mxu0 %v447_v43  ;;  %1825 = vmatprep.subr.bf16.mxu1 %v447_v43 }
  0x3c   : > { %1484 = vperm.xlu0 %1849, %v1433_v1  }
  0x3e   : > { %669 = vmatpush2.bf16.msra.mxu0 %v446_v47  ;;  %1838 = vmatpush2.bf16.msra.mxu1 %v446_v47 }
  0x3f   : > { %670 = vmatprep.subr.bf16.mxu0 %v445_v50  ;;  %1826 = vmatprep.subr.bf16.mxu1 %v445_v50 }
  0x42   : > { %671 = vmatpush2.bf16.msra.mxu0 %v444_v52  ;;  %1839 = vmatpush2.bf16.msra.mxu1 %v444_v52 }
  0x45   : > { %673 = vmatmul.mubr.bf16.vlgmr.msra.gmra.mxu0 %v1851_v55  ;;  %743 = vmatmul.mubr.bf16.vlgmr.msra.gmra.mxu1 %v1854_v56 }
  0x46   : > { %1798 = vmatprep.mubr.msk.bf16.mxu0 %vm593_vm1, %v1857_v58  ;;  %1805 = vmatprep.mubr.msk.bf16.mxu1 %vm593_vm1, %v1859_v59 }
  0x4d   : > { %683 = vmatmul.mubr.bf16.gmra.mxu0 %v1861_v63  ;;  %753 = vmatmul.mubr.bf16.gmra.mxu1 %v1862_v0 }
  0x4e   : > { %1799 = vmatprep.mubr.msk.bf16.mxu0 %vm593_vm1, %v1863_v2  ;;  %1806 = vmatprep.mubr.msk.bf16.mxu1 %vm593_vm1, %v1865_v3 }
  0x55   : > { %693 = vmatmul.mubr.bf16.gmra.mxu0 %v1867_v4  ;;  %763 = vmatmul.mubr.bf16.gmra.mxu1 %v1868_v5 }
  0x56   : > { %1800 = vmatprep.mubr.msk.bf16.mxu0 %vm593_vm1, %v1869_v6  ;;  %1807 = vmatprep.mubr.msk.bf16.mxu1 %vm593_vm1, %v1871_v7 }
  0x5d   : > { %703 = vmatmul.mubr.bf16.gmra.mxu0 %v1873_v8  ;;  %773 = vmatmul.mubr.bf16.gmra.mxu1 %v1874_v9 }
  0x5e   : > { %1801 = vmatprep.mubr.msk.bf16.mxu0 %vm593_vm1, %v1875_v10  ;;  %1808 = vmatprep.mubr.msk.bf16.mxu1 %vm593_vm1, %v1877_v11 }
  0x65   : > { %713 = vmatmul.mubr.bf16.gmra.mxu0 %v1879_v13  ;;  %783 = vmatmul.mubr.bf16.gmra.mxu1 %v1880_v14 }
  0x66   : > { %1802 = vmatprep.mubr.msk.bf16.mxu0 %vm593_vm1, %v1881_v15  ;;  %1809 = vmatprep.mubr.msk.bf16.mxu1 %vm593_vm1, %v1795_v16 }
  0x6d   : > { %723 = vmatmul.mubr.bf16.gmra.mxu0 %v1883_v17  ;;  %793 = vmatmul.mubr.bf16.gmra.mxu1 %v1794_v18 }
  0x6e   : > { %1803 = vmatprep.mubr.msk.bf16.mxu0 %vm593_vm1, %v1886_v19 }
  0x75   : > { %733 = vmatmul.mubr.bf16.gmra.mxu0 %v1888_v20 }
 0x105   : > { %v2360_v21 = vpop.f32.mrf.mxu0  ;;  %v2362_v22 = vpop.f32.mrf.mxu1 }
 0x107   : > { %v2364_v23 = vpop.f32.mrf.mxu0  ;;  %v2366_v24 = vpop.f32.mrf.mxu1 }
 0x108   : > { %v802_v25 = vsel %vm801_vm2, %v2364_v23, 0.0  ;;  %v858_v29 = vsel %vm801_vm2, %v2366_v24, 0.0 }
 0x109   : > { %v2370_v26 = vpop.f32.mrf.mxu0  ;;  %v2372_v27 = vpop.f32.mrf.mxu1  ;;  %v803_v28 = vadd.f32 %v802_v25, %v2360_v21  ;;  %v859_v36 = vadd.f32 %v858_v29, %v2362_v22 }
 0x10b   : > { %v2377_v30 = vpop.f32.mrf.mxu1  ;;  %804 = vadd.xlane.f32.xlu0 %v803_v28  ;;  %v2379_v31 = vpop.f32.mrf.mxu0 }
 0x10c   : > { %v862_v32 = vsel %vm801_vm2, %v2377_v30, 0.0  ;;  %v806_v37 = vsel %vm801_vm2, %v2379_v31, 0.0 }
 0x10d   : > { %v2383_v33 = vpop.f32.mrf.mxu0  ;;  %v2385_v34 = vpop.f32.mrf.mxu1  ;;  %v863_v35 = vadd.f32 %v862_v32, %v2372_v27  ;;  %v807_v43 = vadd.f32 %v806_v37, %v2370_v26 }
 0x10f   : > { %864 = vadd.xlane.f32.xlu1 %v863_v35  ;;  %v2391_v38 = vpop.f32.mrf.mxu1  ;;  %860 = vadd.xlane.f32.xlu0 %v859_v36  ;;  %v2393_v39 = vpop.f32.mrf.mxu0 }
 0x110   : > { %v810_v40 = vsel %vm801_vm2, %v2393_v39, 0.0  ;;  %v866_v45 = vsel %vm801_vm2, %v2391_v38, 0.0 }
 0x111   : > { %v2397_v41 = vpop.f32.mrf.mxu0  ;;  %v2399_v42 = vpop.f32.mrf.mxu1  ;;  %v811_v44 = vadd.f32 %v810_v40, %v2383_v33  ;;  %v867_v51 = vadd.f32 %v866_v45, %v2385_v34 }
 0x113   : > { %v2405_v46 = vpop.f32.mrf.mxu1  ;;  %808 = vadd.xlane.f32.xlu0 %v807_v43  ;;  %812 = vadd.xlane.f32.xlu1 %v811_v44  ;;  %v2407_v47 = vpop.f32.mrf.mxu0 }
 0x114   : > { %v814_v48 = vsel %vm801_vm2, %v2407_v47, 0.0  ;;  %v870_v53 = vsel %vm801_vm2, %v2405_v46, 0.0 }
 0x115   : > { %v2411_v49 = vpop.f32.mrf.mxu0  ;;  %v2413_v50 = vpop.f32.mrf.mxu1  ;;  %v815_v52 = vadd.f32 %v814_v48, %v2397_v41  ;;  %v871_v59 = vadd.f32 %v870_v53, %v2399_v42 }
 0x117   : > { %v2419_v54 = vpop.f32.mrf.mxu1  ;;  %868 = vadd.xlane.f32.xlu0 %v867_v51  ;;  %816 = vadd.xlane.f32.xlu1 %v815_v52  ;;  %v2421_v55 = vpop.f32.mrf.mxu0 }
 0x118   : > { %v818_v56 = vsel %vm801_vm2, %v2421_v55, 0.0  ;;  %v874_v61 = vsel %vm801_vm2, %v2419_v54, 0.0 }
 0x119   : > { %v2425_v57 = vpop.f32.mrf.mxu0  ;;  %v2427_v58 = vpop.f32.mrf.mxu1  ;;  %v819_v60 = vadd.f32 %v818_v56, %v2411_v49  ;;  %v875_v3 = vadd.f32 %v874_v61, %v2413_v50 }
 0x11b   : > { %v2433_v62 = vpop.f32.mrf.mxu1  ;;  %872 = vadd.xlane.f32.xlu1 %v871_v59  ;;  %820 = vadd.xlane.f32.xlu0 %v819_v60  ;;  %v2435_v63 = vpop.f32.mrf.mxu0 }
 0x11c   : > { %v822_v0 = vsel %vm801_vm2, %v2435_v63, 0.0  ;;  %v878_v5 = vsel %vm801_vm2, %v2433_v62, 0.0 }
 0x11d   : > { %v2439_v1 = vpop.f32.mrf.mxu0  ;;  %v2441_v2 = vpop.f32.mrf.mxu1  ;;  %v823_v4 = vadd.f32 %v822_v0, %v2425_v57  ;;  %v879_v11 = vadd.f32 %v878_v5, %v2427_v58 }
 0x11f   : > { %v2447_v6 = vpop.f32.mrf.mxu1  ;;  %876 = vadd.xlane.f32.xlu0 %v875_v3  ;;  %824 = vadd.xlane.f32.xlu1 %v823_v4  ;;  %v2449_v7 = vpop.f32.mrf.mxu0 }
 0x120   : > { %v826_v8 = vsel %vm801_vm2, %v2449_v7, 0.0  ;;  %v882_v13 = vsel %vm801_vm2, %v2447_v6, 0.0 }
 0x121   : > { %v2453_v9 = vpop.f32.mrf.mxu0  ;;  %v2455_v10 = vpop.f32.mrf.mxu1  ;;  %v827_v12 = vadd.f32 %v826_v8, %v2439_v1  ;;  %v883_v19 = vadd.f32 %v882_v13, %v2441_v2 }
 0x123   : > { %v2461_v14 = vpop.f32.mrf.mxu1  ;;  %880 = vadd.xlane.f32.xlu1 %v879_v11  ;;  %828 = vadd.xlane.f32.xlu0 %v827_v12  ;;  %v2463_v15 = vpop.f32.mrf.mxu0 }
 0x124   : > { %v830_v16 = vsel %vm801_vm2, %v2463_v15, 0.0  ;;  %v886_v25 = vsel %vm801_vm2, %v2461_v14, 0.0 }
 0x125   : > { %v2467_v17 = vpop.f32.mrf.mxu0  ;;  %v2469_v18 = vpop.f32.mrf.mxu1  ;;  %v831_v20 = vadd.f32 %v830_v16, %v2453_v9  ;;  %v887_v37 = vadd.f32 %v886_v25, %v2455_v10 }
 0x127   : > { %v2475_v28 = vpop.f32.mrf.mxu1  ;;  %884 = vadd.xlane.f32.xlu0 %v883_v19  ;;  %832 = vadd.xlane.f32.xlu1 %v831_v20  ;;  %v2477_v29 = vpop.f32.mrf.mxu0 }
 0x128   : > { %v834_v32 = vsel %vm801_vm2, %v2477_v29, 0.0  ;;  %v890_v43 = vsel %vm801_vm2, %v2475_v28, 0.0 }
 0x129   : > { %v2481_v35 = vpop.f32.mrf.mxu0  ;;  %v2483_v36 = vpop.f32.mrf.mxu1  ;;  %v835_v40 = vadd.f32 %v834_v32, %v2467_v17  ;;  %v891_v52 = vadd.f32 %v890_v43, %v2469_v18  ;;  %v1436_v43 = vld [vmem:[%s2316_s24 + $0x48] sm:$0xff] }
 0x12b   : > { %v2489_v44 = vpop.f32.mrf.mxu1  ;;  %888 = vadd.xlane.f32.xlu1 %v887_v37  ;;  %836 = vadd.xlane.f32.xlu0 %v835_v40  ;;  %v2491_v45 = vpop.f32.mrf.mxu0 }
 0x12c   : > { %v838_v48 = vsel %vm801_vm2, %v2491_v45, 0.0  ;;  %v894_v59 = vsel %vm801_vm2, %v2489_v44, 0.0 }
 0x12d   : > { %v2495_v51 = vpop.f32.mrf.mxu0  ;;  %v839_v53 = vadd.f32 %v838_v48, %v2481_v35  ;;  %v2499_v56 = vpop.f32.mrf.mxu1  ;;  %v895_v5 = vadd.f32 %v894_v59, %v2483_v36  ;;  %v1435_v48 = vld [vmem:[%s2316_s24 + $0x40] sm:$0xff] }
 0x12f   : > { %892 = vadd.xlane.f32.xlu0 %v891_v52  ;;  %840 = vadd.xlane.f32.xlu1 %v839_v53  ;;  %v2503_v60 = vpop.f32.mrf.mxu0  ;;  %v2505_v61 = vpop.f32.mrf.mxu1 }
 0x130   : > { %v842_v0 = vsel %vm801_vm2, %v2503_v60, 0.0  ;;  %v898_v3 = vsel %vm801_vm2, %v2505_v61, 0.0 }
 0x131   : > { %v2511_v4 = vpop.f32.mrf.mxu0  ;;  %v843_v8 = vadd.f32 %v842_v0, %v2495_v51  ;;  %v798_v11 = vpop.f32.mrf.mxu1  ;;  %v899_v13 = vadd.f32 %v898_v3, %v2499_v56 }
 0x132   : > { %v2537_v3 = vpop.permute.xlu0 %1454 }
 0x133   : > { %896 = vadd.xlane.f32.xlu1 %v895_v5  ;;  %844 = vadd.xlane.f32.xlu0 %v843_v8  ;;  %v2515_v12 = vpop.f32.mrf.mxu0  ;;  %v799_v16 = vpop.f32.mrf.mxu1  ;;  %3095 = vst [vmem:[#allocation2_spill] sm:$0xff] %v2537_v3 }
 0x134   : > { %v846_v19 = vsel %vm801_vm2, %v2515_v12, 0.0  ;;  %v2539_v5 = vpop.permute.xlu1 %1459 }
 0x135   : > { %v2520_v20 = vpop.f32.mrf.mxu0  ;;  %v847_v25 = vadd.f32 %v846_v19, %v2511_v4  ;;  %3096 = vst [vmem:[#allocation3_spill] sm:$0xff] %v2539_v5 }
 0x136   : > { %v2541_v8 = vpop.permute.xlu0 %1464 }
 0x137   : > { %900 = vadd.xlane.f32.xlu0 %v899_v13  ;;  %848 = vadd.xlane.f32.xlu1 %v847_v25  ;;  %v2523_v32 = vpop.f32.mrf.mxu0  ;;  %3097 = vst [vmem:[#allocation4_spill] sm:$0xff] %v2541_v8 }
 0x138   : > { %v850_v37 = vsel %vm801_vm2, %v2523_v32, 0.0  ;;  %v2543_v11 = vpop.permute.xlu1 %1469 }
 0x139   : > { %v851_v40 = vadd.f32 %v850_v37, %v2520_v20  ;;  %v2530_v52 = vpop.f32.mrf.mxu0  ;;  %3098 = vst [vmem:[#allocation5_spill] sm:$0xff] %v2543_v11 }
 0x13a   : > { %v2545_v13 = vpop.permute.xlu0 %1474 }
 0x13b   : > { %852 = vadd.xlane.f32.xlu0 %v851_v40  ;;  %v2532_v53 = vpop.f32.mrf.mxu0  ;;  %3099 = vst [vmem:[#allocation6_spill] sm:$0xff] %v2545_v13 }
 0x13c   : > { %v854_v59 = vsel %vm801_vm2, %v2532_v53, 0.0  ;;  %v2547_v16 = vpop.permute.xlu1 %1479 }
 0x13d   : > { %v855_v0 = vadd.f32 %v854_v59, %v2530_v52  ;;  %3100 = vst [vmem:[#allocation7_spill] sm:$0xff] %v2547_v16 }
 0x13e   : > { %v2549_v19 = vpop.permute.xlu0 %1484 }
 0x13f   : > { %3101 = vst [vmem:[#allocation8_spill] sm:$0xff] %v2549_v19 }
 0x140   : > { %v2551_v25 = vpop.permute.xlu1 %1489 }
 0x141   : > { %3102 = vst [vmem:[#allocation9_spill] sm:$0xff] %v2551_v25 }
 0x148   : > { %1499 = vperm.xlu1 %1850, %v1436_v43  }
 0x151   : > { %1494 = vperm.xlu0 %1849, %v1435_v48  }
 0x16c   : > { %856 = vadd.xlane.f32.xlu1 %v855_v0 }
 0x194   : > { %v805_v37 = vpop.xlane.xlu0 %804 }
 0x195   : > { %v902_v40 = vmul.f32 0.0051020407, %v805_v37 }
 0x197   : > { %v2554_v43 = vsub.f32 %v2360_v21, %v902_v40  ;;  %v2557_v48 = vsub.f32 %v2364_v23, %v902_v40 }
 0x198   : > { %v865_v59 = vpop.xlane.xlu1 %864  ;;  %v861_v0 = vpop.xlane.xlu0 %860 }
 0x199   : > { %3103 = vst [vmem:[#allocation10_spill] sm:$0xff] %v2557_v48  ;;  %v917_v8 = vmul.f32 0.0051020407, %v865_v59  ;;  %v916_v11 = vmul.f32 0.0051020407, %v861_v0  ;;  %v977_v13 = vmul.f32 %v2554_v43, %v2554_v43  ;;  %v978_v19 = vmul.f32 %v2557_v48, %v2557_v48 }
 0x19b   : > { %v2564_v25 = vsub.f32 %v2362_v22, %v916_v11  ;;  %v2567_v37 = vsub.f32 %v2366_v24, %v916_v11  ;;  %v2570_v21 = vsub.f32 %v2377_v30, %v917_v8  ;;  %v1027_v59 = vsel %vm801_vm2, %v978_v19, 0.0 }
 0x19c   : > { %v809_v23 = vpop.xlane.xlu0 %808  ;;  %v813_v40 = vpop.xlane.xlu1 %812  ;;  %v1028_v5 = vadd.f32 %v1027_v59, %v977_v13  ;;  %v2576_v48 = vsub.f32 %v2372_v27, %v917_v8 }
 0x19d   : > { %3104 = vst [vmem:[#allocation11_spill] sm:$0xff] %v2570_v21  ;;  %v903_v0 = vmul.f32 0.0051020407, %v809_v23  ;;  %v904_v16 = vmul.f32 0.0051020407, %v813_v40  ;;  %v1005_v3 = vmul.f32 %v2564_v25, %v2564_v25  ;;  %v1006_v22 = vmul.f32 %v2567_v37, %v2567_v37 }
 0x19e   : > { %3105 = vst [vmem:[#allocation12_spill] sm:$0xff] %v2576_v48  ;;  %1029 = vadd.xlane.f32.xlu1 %v1028_v5  ;;  %v1008_v8 = vmul.f32 %v2570_v21, %v2570_v21 }
 0x19f   : > { %v2581_v24 = vsub.f32 %v2370_v26, %v903_v0  ;;  %v2584_v30 = vsub.f32 %v2379_v31, %v903_v0  ;;  %v2587_v11 = vsub.f32 %v2383_v33, %v904_v16  ;;  %v2590_v13 = vsub.f32 %v2393_v39, %v904_v16 }
 0x1a0   : > { %v869_v19 = vpop.xlane.xlu0 %868  ;;  %v817_v23 = vpop.xlane.xlu1 %816  ;;  %v1083_v27 = vsel %vm801_vm2, %v1006_v22, 0.0  ;;  %v1007_v22 = vmul.f32 %v2576_v48, %v2576_v48 }
 0x1a1   : > { %3106 = vst [vmem:[#allocation13_spill] sm:$0xff] %v2587_v11  ;;  %3107 = vst [vmem:[#allocation14_spill] sm:$0xff] %v2590_v13  ;;  %v918_v40 = vmul.f32 0.0051020407, %v869_v19  ;;  %v905_v26 = vmul.f32 0.0051020407, %v817_v23  ;;  %v1084_v59 = vadd.f32 %v1083_v27, %v1005_v3  ;;  %v979_v31 = vmul.f32 %v2581_v24, %v2581_v24 }
 0x1a2   : > { %v980_v33 = vmul.f32 %v2584_v30, %v2584_v30  ;;  %v981_v39 = vmul.f32 %v2587_v11, %v2587_v11  ;;  %v982_v5 = vmul.f32 %v2590_v13, %v2590_v13  ;;  %v1087_v11 = vsel %vm801_vm2, %v1008_v8, 0.0 }
 0x1a3   : > { %v2604_v16 = vsub.f32 %v2385_v34, %v918_v40  ;;  %v2607_v0 = vsub.f32 %v2391_v38, %v918_v40  ;;  %v2610_v3 = vsub.f32 %v2407_v47, %v905_v26  ;;  %1085 = vadd.xlane.f32.xlu1 %v1084_v59  ;;  %v2615_v19 = vsub.f32 %v2397_v41, %v905_v26 }
 0x1a4   : > { %v873_v23 = vpop.xlane.xlu1 %872  ;;  %v821_v27 = vpop.xlane.xlu0 %820  ;;  %v1031_v13 = vsel %vm801_vm2, %v980_v33, 0.0  ;;  %v1035_v34 = vsel %vm801_vm2, %v982_v5, 0.0  ;;  %v1088_v5 = vadd.f32 %v1087_v11, %v1007_v22 }
 0x1a5   : > { %3108 = vst [vmem:[#allocation15_spill] sm:$0xff] %v2610_v3  ;;  %v919_v38 = vmul.f32 0.0051020407, %v873_v23  ;;  %v906_v40 = vmul.f32 0.0051020407, %v821_v27  ;;  %v1032_v21 = vadd.f32 %v1031_v13, %v979_v31  ;;  %v1036_v47 = vadd.f32 %v1035_v34, %v981_v39 }
 0x1a6   : > { %v1009_v59 = vmul.f32 %v2604_v16, %v2604_v16  ;;  %v1010_v48 = vmul.f32 %v2607_v0, %v2607_v0  ;;  %v984_v41 = vmul.f32 %v2610_v3, %v2610_v3 }
 0x1a7   : > { %v2627_v26 = vsub.f32 %v2405_v46, %v919_v38  ;;  %v2630_v33 = vsub.f32 %v2411_v49, %v906_v40  ;;  %v2633_v8 = vsub.f32 %v2421_v55, %v906_v40  ;;  %1033 = vadd.xlane.f32.xlu0 %v1032_v21  ;;  %v2636_v13 = vsub.f32 %v2399_v42, %v919_v38 }
 0x1a8   : > { %1037 = vadd.xlane.f32.xlu1 %v1036_v47  ;;  %v877_v31 = vpop.xlane.xlu0 %876  ;;  %v825_v39 = vpop.xlane.xlu1 %824  ;;  %v1091_v23 = vsel %vm801_vm2, %v1010_v48, 0.0  ;;  %v983_v46 = vmul.f32 %v2615_v19, %v2615_v19  ;;  %v1039_v3 = vsel %vm801_vm2, %v984_v41, 0.0 }
 0x1a9   : > { %v920_v27 = vmul.f32 0.0051020407, %v877_v31  ;;  %v907_v34 = vmul.f32 0.0051020407, %v825_v39  ;;  %v1092_v49 = vadd.f32 %v1091_v23, %v1009_v59  ;;  %v985_v55 = vmul.f32 %v2630_v33, %v2630_v33 }
 0x1aa   : > { %v986_v42 = vmul.f32 %v2633_v8, %v2633_v8  ;;  %v1012_v21 = vmul.f32 %v2627_v26, %v2627_v26  ;;  %v1040_v59 = vadd.f32 %v1039_v3, %v983_v46 }
 0x1ab   : > { %v2649_v11 = vsub.f32 %v2413_v50, %v920_v27  ;;  %v2652_v48 = vsub.f32 %v2419_v54, %v920_v27  ;;  %v2655_v22 = vsub.f32 %v2435_v63, %v907_v34  ;;  %1089 = vadd.xlane.f32.xlu0 %v1088_v5  ;;  %v2658_v38 = vsub.f32 %v2425_v57, %v907_v34 }
 0x1ac   : > { %1093 = vadd.xlane.f32.xlu1 %v1092_v49  ;;  %v881_v40 = vpop.xlane.xlu1 %880  ;;  %v829_v47 = vpop.xlane.xlu0 %828  ;;  %v1043_v41 = vsel %vm801_vm2, %v986_v42, 0.0  ;;  %v1011_v50 = vmul.f32 %v2636_v13, %v2636_v13  ;;  %v1095_v23 = vsel %vm801_vm2, %v1012_v21, 0.0 }
 0x1ad   : > { %v921_v31 = vmul.f32 0.0051020407, %v881_v40  ;;  %v908_v39 = vmul.f32 0.0051020407, %v829_v47  ;;  %v1044_v54 = vadd.f32 %v1043_v41, %v985_v55  ;;  %v1013_v63 = vmul.f32 %v2649_v11, %v2649_v11 }
 0x1ae   : > { %v1014_v57 = vmul.f32 %v2652_v48, %v2652_v48  ;;  %v988_v5 = vmul.f32 %v2655_v22, %v2655_v22  ;;  %v1096_v42 = vadd.f32 %v1095_v23, %v1011_v50 }
 0x1af   : > { %v2671_v3 = vsub.f32 %v2433_v62, %v921_v31  ;;  %v2674_v46 = vsub.f32 %v2439_v1, %v908_v39  ;;  %v2677_v27 = vsub.f32 %v2449_v7, %v908_v39  ;;  %1041 = vadd.xlane.f32.xlu0 %v1040_v59  ;;  %v2680_v34 = vsub.f32 %v2427_v58, %v921_v31 }
 0x1b0   : > { %1045 = vadd.xlane.f32.xlu1 %v1044_v54  ;;  %v885_v49 = vpop.xlane.xlu0 %884  ;;  %v833_v55 = vpop.xlane.xlu1 %832  ;;  %v1099_v21 = vsel %vm801_vm2, %v1014_v57, 0.0  ;;  %v987_v62 = vmul.f32 %v2658_v38, %v2658_v38  ;;  %v1047_v41 = vsel %vm801_vm2, %v988_v5, 0.0 }
 0x1b1   : > { %v922_v40 = vmul.f32 0.0051020407, %v885_v49  ;;  %v909_v47 = vmul.f32 0.0051020407, %v833_v55  ;;  %v1100_v1 = vadd.f32 %v1099_v21, %v1013_v63  ;;  %v989_v7 = vmul.f32 %v2674_v46, %v2674_v46 }
 0x1b2   : > { %v990_v58 = vmul.f32 %v2677_v27, %v2677_v27  ;;  %v1016_v59 = vmul.f32 %v2671_v3, %v2671_v3  ;;  %v1048_v57 = vadd.f32 %v1047_v41, %v987_v62 }
 0x1b3   : > { %v2693_v50 = vsub.f32 %v2441_v2, %v922_v40  ;;  %v2696_v31 = vsub.f32 %v2447_v6, %v922_v40  ;;  %v2699_v39 = vsub.f32 %v2463_v15, %v909_v47  ;;  %1097 = vadd.xlane.f32.xlu0 %v1096_v42  ;;  %v2702_v54 = vsub.f32 %v2453_v9, %v909_v47 }
 0x1b4   : > { %1101 = vadd.xlane.f32.xlu1 %v1100_v1  ;;  %v889_v23 = vpop.xlane.xlu1 %888  ;;  %v837_v63 = vpop.xlane.xlu0 %836  ;;  %v1051_v5 = vsel %vm801_vm2, %v990_v58, 0.0  ;;  %v1015_v2 = vmul.f32 %v2680_v34, %v2680_v34  ;;  %v1103_v21 = vsel %vm801_vm2, %v1016_v59, 0.0 }
 0x1b5   : > { %v923_v49 = vmul.f32 0.0051020407, %v889_v23  ;;  %v910_v55 = vmul.f32 0.0051020407, %v837_v63  ;;  %v1052_v6 = vadd.f32 %v1051_v5, %v989_v7  ;;  %v1017_v15 = vmul.f32 %v2693_v50, %v2693_v50 }
 0x1b6   : > { %v1018_v9 = vmul.f32 %v2696_v31, %v2696_v31  ;;  %v992_v42 = vmul.f32 %v2699_v39, %v2699_v39  ;;  %v1104_v58 = vadd.f32 %v1103_v21, %v1015_v2 }
 0x1b7   : > { %v2715_v62 = vsub.f32 %v2461_v14, %v923_v49  ;;  %v2718_v40 = vsub.f32 %v2467_v17, %v910_v55  ;;  %v2721_v47 = vsub.f32 %v2477_v29, %v910_v55  ;;  %1049 = vadd.xlane.f32.xlu0 %v1048_v57  ;;  %v2724_v1 = vsub.f32 %v2455_v10, %v923_v49 }
 0x1b8   : > { %1053 = vadd.xlane.f32.xlu1 %v1052_v6  ;;  %v893_v41 = vpop.xlane.xlu0 %892  ;;  %v841_v7 = vpop.xlane.xlu1 %840  ;;  %v1107_v59 = vsel %vm801_vm2, %v1018_v9, 0.0  ;;  %v991_v14 = vmul.f32 %v2702_v54, %v2702_v54  ;;  %v1055_v5 = vsel %vm801_vm2, %v992_v42, 0.0 }
 0x1b9   : > { %v924_v23 = vmul.f32 0.0051020407, %v893_v41  ;;  %v911_v63 = vmul.f32 0.0051020407, %v841_v7  ;;  %v1108_v17 = vadd.f32 %v1107_v59, %v1017_v15  ;;  %v993_v29 = vmul.f32 %v2718_v40, %v2718_v40 }
 0x1ba   : > { %v994_v10 = vmul.f32 %v2721_v47, %v2721_v47  ;;  %v1020_v57 = vmul.f32 %v2715_v62, %v2715_v62  ;;  %v1056_v9 = vadd.f32 %v1055_v5, %v991_v14 }
 0x1bb   : > { %v2737_v2 = vsub.f32 %v2469_v18, %v924_v23  ;;  %v2740_v49 = vsub.f32 %v2475_v28, %v924_v23  ;;  %v2743_v55 = vsub.f32 %v2491_v45, %v911_v63  ;;  %1105 = vadd.xlane.f32.xlu0 %v1104_v58  ;;  %v2746_v6 = vsub.f32 %v2481_v35, %v911_v63 }
 0x1bc   : > { %1109 = vadd.xlane.f32.xlu1 %v1108_v17  ;;  %v897_v21 = vpop.xlane.xlu1 %896  ;;  %v845_v15 = vpop.xlane.xlu0 %844  ;;  %v1059_v42 = vsel %vm801_vm2, %v994_v10, 0.0  ;;  %v1019_v18 = vmul.f32 %v2724_v1, %v2724_v1  ;;  %v1111_v59 = vsel %vm801_vm2, %v1020_v57, 0.0 }
 0x1bd   : > { %v925_v41 = vmul.f32 0.0051020407, %v897_v21  ;;  %v912_v7 = vmul.f32 0.0051020407, %v845_v15  ;;  %v1060_v28 = vadd.f32 %v1059_v42, %v993_v29  ;;  %v1021_v45 = vmul.f32 %v2737_v2, %v2737_v2 }
 0x1be   : > { %v1022_v35 = vmul.f32 %v2740_v49, %v2740_v49  ;;  %v996_v58 = vmul.f32 %v2743_v55, %v2743_v55  ;;  %v1112_v10 = vadd.f32 %v1111_v59, %v1019_v18 }
 0x1bf   : > { %v2759_v14 = vsub.f32 %v2489_v44, %v925_v41  ;;  %v2762_v23 = vsub.f32 %v2495_v51, %v912_v7  ;;  %v2765_v63 = vsub.f32 %v2503_v60, %v912_v7  ;;  %1057 = vadd.xlane.f32.xlu0 %v1056_v9  ;;  %v2768_v17 = vsub.f32 %v2483_v36, %v925_v41 }
 0x1c0   : > { %1061 = vadd.xlane.f32.xlu1 %v1060_v28  ;;  %v901_v5 = vpop.xlane.xlu0 %900  ;;  %v849_v29 = vpop.xlane.xlu1 %848  ;;  %v1115_v57 = vsel %vm801_vm2, %v1022_v35, 0.0  ;;  %v995_v44 = vmul.f32 %v2746_v6, %v2746_v6  ;;  %v1063_v42 = vsel %vm801_vm2, %v996_v58, 0.0 }
 0x1c1   : > { %3109 = vst [vmem:[#allocation16_spill] sm:$0xff] %v2759_v14  ;;  %v926_v21 = vmul.f32 0.0051020407, %v901_v5  ;;  %v913_v15 = vmul.f32 0.0051020407, %v849_v29  ;;  %v1116_v51 = vadd.f32 %v1115_v57, %v1021_v45  ;;  %v997_v60 = vmul.f32 %v2762_v23, %v2762_v23 }
 0x1c2   : > { %v998_v36 = vmul.f32 %v2765_v63, %v2765_v63  ;;  %v1024_v9 = vmul.f32 %v2759_v14, %v2759_v14  ;;  %v1064_v45 = vadd.f32 %v1063_v42, %v995_v44  ;;  %v1023_v58 = vmul.f32 %v2768_v17, %v2768_v17 }
 0x1c3   : > { %v2781_v18 = vsub.f32 %v2499_v56, %v926_v21  ;;  %v2784_v41 = vsub.f32 %v2505_v61, %v926_v21  ;;  %v2787_v7 = vsub.f32 %v2515_v12, %v913_v15  ;;  %1113 = vadd.xlane.f32.xlu0 %v1112_v10  ;;  %v2790_v28 = vsub.f32 %v2511_v4, %v913_v15 }
 0x1c4   : > { %1117 = vadd.xlane.f32.xlu1 %v1116_v51  ;;  %v853_v59 = vpop.xlane.xlu0 %852  ;;  %v1067_v35 = vsel %vm801_vm2, %v998_v36, 0.0  ;;  %v1119_v61 = vsel %vm801_vm2, %v1024_v9, 0.0 }
 0x1c5   : > { %3110 = vst [vmem:[#allocation17_spill] sm:$0xff] %v2781_v18  ;;  %3111 = vst [vmem:[#allocation18_spill] sm:$0xff] %v2784_v41  ;;  %v914_v56 = vmul.f32 0.0051020407, %v853_v59  ;;  %v1068_v5 = vadd.f32 %v1067_v35, %v997_v60  ;;  %v1025_v12 = vmul.f32 %v2781_v18, %v2781_v18  ;;  %v1026_v29 = vmul.f32 %v2784_v41, %v2784_v41  ;;  %v1438_v59 = vld [vmem:[%s2316_s24 + $0x58] sm:$0xff]  ;;  %v1153_v41 = vld [vmem:[%s2849_s27 + $0x8] sm:$0xff] }
 0x1c6   : > { %v1000_v4 = vmul.f32 %v2787_v7, %v2787_v7  ;;  %v1120_v44 = vadd.f32 %v1119_v61, %v1023_v58  ;;  %v999_v51 = vmul.f32 %v2790_v28, %v2790_v28  ;;  %v1442_v35 = vld [vmem:[%s2316_s24 + $0x78] sm:$0xff]  ;;  %v1444_v58 = vld [vmem:[%s2316_s24 + $0x88] sm:$0xff] }
 0x1c7   : > { %v2803_v10 = vsub.f32 %v2520_v20, %v914_v56  ;;  %v2806_v57 = vsub.f32 %v2523_v32, %v914_v56  ;;  %1065 = vadd.xlane.f32.xlu0 %v1064_v45  ;;  %v1123_v21 = vsel %vm801_vm2, %v1026_v29, 0.0  ;;  %v1440_v45 = vld [vmem:[%s2316_s24 + $0x68] sm:$0xff]  ;;  %v1446_v56 = vld [vmem:[%s2316_s24 + $0x98] sm:$0xff] }
 0x1c8   : > { %1069 = vadd.xlane.f32.xlu1 %v1068_v5  ;;  %v1124_v15 = vadd.f32 %v1123_v21, %v1025_v12  ;;  %v1071_v32 = vsel %vm801_vm2, %v1000_v4, 0.0  ;;  %v2822_v5 = vpop.permute.xlu1 %1499  ;;  %v1448_v61 = vld [vmem:[%s2316_s24 + $0xa8] sm:$0xff] }
 0x1c9   : > { %v1001_v42 = vmul.f32 %v2803_v10, %v2803_v10  ;;  %v1002_v20 = vmul.f32 %v2806_v57, %v2806_v57  ;;  %v1072_v9 = vadd.f32 %v1071_v32, %v999_v51  ;;  %v1439_v32 = vld [vmem:[%s2316_s24 + $0x60] sm:$0xff] }
 0x1cb   : > { %1121 = vadd.xlane.f32.xlu0 %v1120_v44  ;;  %v1075_v60 = vsel %vm801_vm2, %v1002_v20, 0.0  ;;  %v1437_v20 = vld [vmem:[%s2316_s24 + $0x50] sm:$0xff] }
 0x1cc   : > { %1125 = vadd.xlane.f32.xlu1 %v1124_v15  ;;  %v1076_v36 = vadd.f32 %v1075_v60, %v1001_v42  ;;  %v1445_v60 = vld [vmem:[%s2316_s24 + $0x90] sm:$0xff] }
 0x1cf   : > { %1073 = vadd.xlane.f32.xlu0 %v1072_v9 }
 0x1d0   : > { %1077 = vadd.xlane.f32.xlu1 %v1076_v36  ;;  %v1447_v36 = vld [vmem:[%s2316_s24 + $0xa0] sm:$0xff] }
 0x1e1   : > { %1509 = vperm.xlu1 %1850, %v1438_v59  }
 0x1e5   : > { %1519 = vperm.xlu1 %1850, %v1440_v45   ;;  %v1449_v45 = vld [vmem:[%s2316_s24 + $0xb0] sm:$0xff] }
 0x1e9   : > { %1529 = vperm.xlu1 %1850, %v1442_v35  }
 0x1ed   : > { %1539 = vperm.xlu1 %1850, %v1444_v58   ;;  %v2843_v58 = vpop.permute.xlu0 %1494 }
 0x1f1   : > { %1549 = vperm.xlu1 %1850, %v1446_v56  }
 0x1f5   : > { %1559 = vperm.xlu1 %1850, %v1448_v61   ;;  %v857_v12 = vpop.xlane.xlu1 %856 }
 0x1f6   : > { %v915_v29 = vmul.f32 0.0051020407, %v857_v12 }
 0x1f8   : > { %v2826_v4 = vsub.f32 %v2530_v52, %v915_v29  ;;  %v2829_v44 = vsub.f32 %v2532_v53, %v915_v29  ;;  %v1441_v52 = vld [vmem:[%s2316_s24 + $0x70] sm:$0xff]  ;;  %v1443_v53 = vld [vmem:[%s2316_s24 + $0x80] sm:$0xff] }
 0x1fa   : > { %3112 = vst [vmem:[#allocation19_spill] sm:$0xff] %v2826_v4  ;;  %3113 = vst [vmem:[#allocation20_spill] sm:$0xff] %v2829_v44  ;;  %v1003_v21 = vmul.f32 %v2826_v4, %v2826_v4  ;;  %v1004_v15 = vmul.f32 %v2829_v44, %v2829_v44 }
 0x1fc   : > { %v1079_v51 = vsel %vm801_vm2, %v1004_v15, 0.0 }
 0x1fd   : > { %v1080_v42 = vadd.f32 %v1079_v51, %v1003_v21 }
 0x1ff   : > { %1081 = vadd.xlane.f32.xlu0 %v1080_v42 }
 0x215   : > { %1504 = vperm.xlu0 %1849, %v1437_v20  }
 0x219   : > { %1514 = vperm.xlu0 %1849, %v1439_v32  }
 0x21d   : > { %1524 = vperm.xlu0 %1849, %v1441_v52  }
 0x221   : > { %1534 = vperm.xlu0 %1849, %v1443_v53  }
 0x225   : > { %1544 = vperm.xlu0 %1849, %v1445_v60  }
 0x227   : > { %v1030_v9 = vpop.xlane.xlu1 %1029 }
 0x228   : > { %v1127_v59 = vmul.f32 0.0051020407, %v1030_v9 }
 0x229   : > { %1554 = vperm.xlu0 %1849, %v1447_v36  }
 0x22a   : > { %v1177_v35 = vadd.f32 0.001, %v1127_v59 }
 0x22c   : > { %v1086_v56 = vpop.xlane.xlu1 %1085  ;;  %1889 = vrsqrt.f32 %v1177_v35 }
 0x22d   : > { %v1141_v61 = vmul.f32 0.0051020407, %v1086_v56  ;;  %1564 = vperm.xlu0 %1849, %v1449_v45   ;;  %v1152_v45 = vld [vmem:[%s2849_s27] sm:$0xff] }
 0x22f   : > { %v1191_v12 = vadd.f32 0.001, %v1141_v61 }
 0x230   : > { %v1034_v29 = vpop.xlane.xlu0 %1033 }
 0x231   : > { %1891 = vrsqrt.f32 %v1191_v12  ;;  %v1128_v21 = vmul.f32 0.0051020407, %v1034_v29  ;;  %v1038_v15 = vpop.xlane.xlu1 %1037 }
 0x232   : > { %v1129_v51 = vmul.f32 0.0051020407, %v1038_v15 }
 0x233   : > { %v1178_v42 = vadd.f32 0.001, %v1128_v21 }
 0x234   : > { %v1179_v20 = vadd.f32 0.001, %v1129_v51  ;;  %v1090_v32 = vpop.xlane.xlu0 %1089  ;;  %v1166_v51 = vld [vmem:[%s2849_s27 + $0x70] sm:$0xff] }
 0x235   : > { %1893 = vrsqrt.f32 %v1178_v42  ;;  %v1142_v52 = vmul.f32 0.0051020407, %v1090_v32  ;;  %v1094_v53 = vpop.xlane.xlu1 %1093 }
 0x236   : > { %v1143_v60 = vmul.f32 0.0051020407, %v1094_v53  ;;  %1895 = vrsqrt.f32 %v1179_v20 }
 0x237   : > { %v1192_v36 = vadd.f32 0.001, %v1142_v52 }
 0x238   : > { %v1193_v9 = vadd.f32 0.001, %v1143_v60  ;;  %v1042_v59 = vpop.xlane.xlu0 %1041 }
 0x239   : > { %1897 = vrsqrt.f32 %v1192_v36  ;;  %v1130_v35 = vmul.f32 0.0051020407, %v1042_v59  ;;  %v1046_v56 = vpop.xlane.xlu1 %1045  ;;  %v1890_v61 = vpop.eup %1889 }
 0x23a   : > { %1899 = vrsqrt.f32 %v1193_v9  ;;  %v1131_v29 = vmul.f32 0.0051020407, %v1046_v56  ;;  %v1227_v21 = vmul.f32 %v1890_v61, %v1152_v45 }
 0x23b   : > { %v1180_v12 = vadd.f32 0.001, %v1130_v35 }
 0x23c   : > { %v1098_v15 = vpop.xlane.xlu0 %1097  ;;  %1254 = vperm.xlu0 %1849, %v1227_v21   ;;  %v1181_v52 = vadd.f32 0.001, %v1131_v29 }
 0x23d   : > { %v1144_v42 = vmul.f32 0.0051020407, %v1098_v15  ;;  %v1102_v32 = vpop.xlane.xlu1 %1101  ;;  %1901 = vrsqrt.f32 %v1180_v12  ;;  %v1154_v12 = vld [vmem:[%s2849_s27 + $0x10] sm:$0xff] }
 0x23e   : > { %v1892_v53 = vpop.eup %1891  ;;  %v1145_v20 = vmul.f32 0.0051020407, %v1102_v32  ;;  %v1167_v32 = vld [vmem:[%s2849_s27 + $0x78] sm:$0xff] }
 0x23f   : > { %v1194_v60 = vadd.f32 0.001, %v1144_v42  ;;  %v1241_v36 = vmul.f32 %v1892_v53, %v1166_v51 }
 0x240   : > { %v1050_v59 = vpop.xlane.xlu0 %1049  ;;  %v1195_v45 = vadd.f32 0.001, %v1145_v20 }
 0x241   : > { %1903 = vrsqrt.f32 %v1194_v60  ;;  %v1054_v9 = vpop.xlane.xlu1 %1053  ;;  %1324 = vperm.xlu1 %1850, %v1241_v36   ;;  %v1132_v56 = vmul.f32 0.0051020407, %v1050_v59 }
 0x242   : > { %v1894_v35 = vpop.eup %1893  ;;  %1905 = vrsqrt.f32 %v1181_v52  ;;  %v1133_v51 = vmul.f32 0.0051020407, %v1054_v9 }
 0x243   : > { %v1228_v61 = vmul.f32 %v1894_v35, %v1153_v41  ;;  %v1896_v15 = vpop.eup %1895  ;;  %1907 = vrsqrt.f32 %v1195_v45  ;;  %v1182_v53 = vadd.f32 0.001, %v1132_v56  ;;  %v1168_v41 = vld [vmem:[%s2849_s27 + $0x80] sm:$0xff]  ;;  %v1169_v45 = vld [vmem:[%s2849_s27 + $0x88] sm:$0xff] }
 0x244   : > { %v1106_v21 = vpop.xlane.xlu0 %1105  ;;  %v1229_v20 = vmul.f32 %v1896_v15, %v1154_v12  ;;  %v1183_v44 = vadd.f32 0.001, %v1133_v51 }
 0x245   : > { %v1146_v18 = vmul.f32 0.0051020407, %v1106_v21  ;;  %v1110_v29 = vpop.xlane.xlu1 %1109  ;;  %1259 = vperm.xlu1 %1850, %v1228_v61  }
 0x246   : > { %v1898_v42 = vpop.eup %1897  ;;  %v1147_v21 = vmul.f32 0.0051020407, %v1110_v29 }
 0x247   : > { %v1196_v60 = vadd.f32 0.001, %v1146_v18  ;;  %v1242_v36 = vmul.f32 %v1898_v42, %v1167_v32  ;;  %v1900_v52 = vpop.eup %1899  ;;  %v1155_v18 = vld [vmem:[%s2849_s27 + $0x18] sm:$0xff] }
 0x248   : > { %v1058_v59 = vpop.xlane.xlu0 %1057  ;;  %v1243_v61 = vmul.f32 %v1900_v52, %v1168_v41  ;;  %v1197_v42 = vadd.f32 0.001, %v1147_v21 }
 0x249   : > { %1909 = vrsqrt.f32 %v1196_v60  ;;  %v1062_v35 = vpop.xlane.xlu1 %1061  ;;  %1329 = vperm.xlu0 %1849, %v1242_v36   ;;  %1264 = vperm.xlu1 %1850, %v1229_v20   ;;  %v1134_v15 = vmul.f32 0.0051020407, %v1058_v59 }
 0x24a   : > { %1911 = vrsqrt.f32 %v1182_v53  ;;  %v1902_v4 = vpop.eup %1901  ;;  %v1156_v53 = vld [vmem:[%s2849_s27 + $0x20] sm:$0xff]  ;;  %v1135_v41 = vmul.f32 0.0051020407, %v1062_v35 }
 0x24b   : > { %1913 = vrsqrt.f32 %v1183_v44  ;;  %v1230_v36 = vmul.f32 %v1902_v4, %v1155_v18  ;;  %v1184_v52 = vadd.f32 0.001, %v1134_v15  ;;  %v1170_v4 = vld [vmem:[%s2849_s27 + $0x90] sm:$0xff] }
 0x24c   : > { %v1114_v9 = vpop.xlane.xlu0 %1113 }
 0x24d   : > { %v1148_v56 = vmul.f32 0.0051020407, %v1114_v9  ;;  %1334 = vperm.xlu1 %1850, %v1243_v61   ;;  %v1118_v12 = vpop.xlane.xlu1 %1117 }
 0x24e   : > { %v1904_v32 = vpop.eup %1903 }
 0x24f   : > { %v1198_v60 = vadd.f32 0.001, %v1148_v56  ;;  %v1244_v14 = vmul.f32 %v1904_v32, %v1169_v45  ;;  %v1906_v51 = vpop.eup %1905  ;;  %v1171_v45 = vld [vmem:[%s2849_s27 + $0x98] sm:$0xff]  ;;  %v1185_v32 = vadd.f32 0.001, %v1135_v41 }
 0x250   : > { %v1066_v29 = vpop.xlane.xlu0 %1065  ;;  %v1908_v61 = vpop.eup %1907  ;;  %v1231_v59 = vmul.f32 %v1906_v51, %v1156_v53  ;;  %v1157_v51 = vld [vmem:[%s2849_s27 + $0x28] sm:$0xff] }
 0x251   : > { %1915 = vrsqrt.f32 %v1198_v60  ;;  %v1136_v20 = vmul.f32 0.0051020407, %v1066_v29  ;;  %1339 = vperm.xlu0 %1849, %v1244_v14   ;;  %1269 = vperm.xlu1 %1850, %v1230_v36   ;;  %v1070_v9 = vpop.xlane.xlu1 %1069  ;;  %v1149_v60 = vmul.f32 0.0051020407, %v1118_v12  ;;  %v1245_v35 = vmul.f32 %v1908_v61, %v1170_v4 }
 0x252   : > { %1917 = vrsqrt.f32 %v1197_v42  ;;  %v1137_v53 = vmul.f32 0.0051020407, %v1070_v9 }
 0x253   : > { %v1186_v44 = vadd.f32 0.001, %v1136_v20 }
 0x254   : > { %v1122_v21 = vpop.xlane.xlu0 %1121 }
 0x255   : > { %1919 = vrsqrt.f32 %v1186_v44  ;;  %v1150_v18 = vmul.f32 0.0051020407, %v1122_v21  ;;  %1274 = vperm.xlu1 %1850, %v1231_v59   ;;  %v1126_v20 = vpop.xlane.xlu1 %1125  ;;  %v1173_v59 = vld [vmem:[%s2849_s27 + $0xa8] sm:$0xff]  ;;  %v1158_v21 = vld [vmem:[%s2849_s27 + $0x30] sm:$0xff] }
 0x256   : > { %v1910_v56 = vpop.eup %1909  ;;  %1921 = vrsqrt.f32 %v1184_v52  ;;  %v1199_v52 = vadd.f32 0.001, %v1149_v60  ;;  %v1151_v4 = vmul.f32 0.0051020407, %v1126_v20  ;;  %v1159_v20 = vld [vmem:[%s2849_s27 + $0x38] sm:$0xff] }
 0x257   : > { %v1200_v14 = vadd.f32 0.001, %v1150_v18  ;;  %v1246_v36 = vmul.f32 %v1910_v56, %v1171_v45  ;;  %v1912_v15 = vpop.eup %1911  ;;  %v1187_v45 = vadd.f32 0.001, %v1137_v53  ;;  %v1175_v53 = vld [vmem:[%s2849_s27 + $0xb8] sm:$0xff] }
 0x258   : > { %v1074_v42 = vpop.xlane.xlu0 %1073  ;;  %v1914_v44 = vpop.eup %1913  ;;  %v1232_v41 = vmul.f32 %v1912_v15, %v1157_v51  ;;  %v1201_v15 = vadd.f32 0.001, %v1151_v4 }
 0x259   : > { %1923 = vrsqrt.f32 %v1200_v14  ;;  %v1138_v29 = vmul.f32 0.0051020407, %v1074_v42  ;;  %1349 = vperm.xlu0 %1849, %v1246_v36   ;;  %1344 = vperm.xlu1 %1850, %v1245_v35   ;;  %v1233_v9 = vmul.f32 %v1914_v44, %v1158_v21  ;;  %v1078_v14 = vpop.xlane.xlu1 %1077  ;;  %v1172_v36 = vld [vmem:[%s2849_s27 + $0xa0] sm:$0xff]  ;;  %v1163_v21 = vld [vmem:[%s2849_s27 + $0x58] sm:$0xff] }
 0x25a   : > { %1925 = vrsqrt.f32 %v1185_v32  ;;  %v1161_v32 = vld [vmem:[%s2849_s27 + $0x48] sm:$0xff]  ;;  %v1139_v42 = vmul.f32 0.0051020407, %v1078_v14 }
 0x25b   : > { %v1188_v12 = vadd.f32 0.001, %v1138_v29 }
 0x25d   : > { %1927 = vrsqrt.f32 %v1188_v12  ;;  %1279 = vperm.xlu1 %1850, %v1232_v41  }
 0x25e   : > { %v1916_v61 = vpop.eup %1915  ;;  %1929 = vrsqrt.f32 %v1199_v52  ;;  %v1189_v52 = vadd.f32 0.001, %v1139_v42 }
 0x25f   : > { %v1248_v18 = vmul.f32 %v1916_v61, %v1173_v59  ;;  %v1918_v56 = vpop.eup %1917  ;;  %1931 = vrsqrt.f32 %v1187_v45  ;;  %v1160_v61 = vld [vmem:[%s2849_s27 + $0x40] sm:$0xff] }
 0x260   : > { %v1247_v29 = vmul.f32 %v1918_v56, %v1172_v36  ;;  %1933 = vrsqrt.f32 %v1201_v15  ;;  %v1174_v56 = vld [vmem:[%s2849_s27 + $0xb0] sm:$0xff]  ;;  %v1176_v15 = vld [vmem:[%s2849_s27 + $0xc0] sm:$0xff] }
 0x261   : > { %1359 = vperm.xlu0 %1849, %v1248_v18   ;;  %1284 = vperm.xlu1 %1850, %v1233_v9   ;;  %1935 = vrsqrt.f32 %v1189_v52  ;;  %v1162_v36 = vld [vmem:[%s2849_s27 + $0x50] sm:$0xff] }
 0x262   : > { %v1920_v60 = vpop.eup %1919 }
 0x263   : > { %v1922_v35 = vpop.eup %1921  ;;  %v1236_v51 = vmul.f32 %v1920_v60, %v1161_v32 }
 0x264   : > { %v1234_v41 = vmul.f32 %v1922_v35, %v1159_v20  ;;  %v1450_v20 = vld [vmem:[%s2316_s24 + $0xb8] sm:$0xff] }
 0x265   : > { %1299 = vperm.xlu0 %1849, %v1236_v51   ;;  %1354 = vperm.xlu1 %1850, %v1247_v29   ;;  %v1164_v29 = vld [vmem:[%s2849_s27 + $0x60] sm:$0xff] }
 0x266   : > { %v1924_v44 = vpop.eup %1923 }
 0x267   : > { %v1250_v12 = vmul.f32 %v1924_v44, %v1175_v53  ;;  %v1926_v59 = vpop.eup %1925 }
 0x268   : > { %v1235_v18 = vmul.f32 %v1926_v59, %v1160_v61 }
 0x269   : > { %1369 = vperm.xlu0 %1849, %v1250_v12   ;;  %1289 = vperm.xlu1 %1850, %v1234_v41  }
 0x26a   : > { %v1928_v45 = vpop.eup %1927 }
 0x26b   : > { %v1238_v4 = vmul.f32 %v1928_v45, %v1163_v21  ;;  %v1930_v9 = vpop.eup %1929  ;;  %v1165_v21 = vld [vmem:[%s2849_s27 + $0x68] sm:$0xff]  ;;  %v2881_v45 = vpop.permute.xlu1 %1509 }
 0x26c   : > { %v1932_v14 = vpop.eup %1931  ;;  %v1249_v32 = vmul.f32 %v1930_v9, %v1174_v56  ;;  %v1451_v9 = vld [vmem:[%s2316_s24 + $0xc0] sm:$0xff] }
 0x26d   : > { %1309 = vperm.xlu0 %1849, %v1238_v4   ;;  %1294 = vperm.xlu1 %1850, %v1235_v18   ;;  %v1237_v60 = vmul.f32 %v1932_v14, %v1162_v36  ;;  %v1934_v35 = vpop.eup %1933 }
 0x26e   : > { %v1251_v42 = vmul.f32 %v1934_v35, %v1176_v15  ;;  %v1936_v51 = vpop.eup %1935 }
 0x26f   : > { %v1239_v53 = vmul.f32 %v1936_v51, %v1164_v29  ;;  %v2884_v56 = vpop.permute.xlu1 %1519 }
 0x270   : > { %3115 = vst [vmem:[#allocation22_spill] sm:$0xff] %v2884_v56 }
 0x271   : > { %1364 = vperm.xlu1 %1850, %v1249_v32  }
 0x273   : > { %v1530_v32 = vpop.permute.xlu1 %1529 }
 0x275   : > { %1304 = vperm.xlu1 %1850, %v1237_v60  }
 0x277   : > { %v1540_v60 = vpop.permute.xlu1 %1539 }
 0x279   : > { %1374 = vperm.xlu1 %1850, %v1251_v42  }
 0x27b   : > { %v2890_v15 = vpop.permute.xlu1 %1549 }
 0x27d   : > { %1314 = vperm.xlu1 %1850, %v1239_v53  }
 0x27f   : > { %v2895_v51 = vpop.permute.xlu1 %1559 }
 0x281   : > { %1569 = vperm.xlu1 %1850, %v1450_v20   ;;  %v3116_v20 = vld [vmem:[#allocation10_spill] sm:$0xff] }
 0x288   : > { %v1082_v44 = vpop.xlane.xlu0 %1081 }
 0x289   : > { %v1140_v52 = vmul.f32 0.0051020407, %v1082_v44 }
 0x28b   : > { %v1190_v12 = vadd.f32 0.001, %v1140_v52  ;;  %v3117_v52 = vld [vmem:[#allocation2_spill] sm:$0xff] }
 0x28d   : > { %1937 = vrsqrt.f32 %v1190_v12 }
 0x290   : > { %v2876_v41 = vpop.permute.xlu0 %1504 }
 0x294   : > { %v2878_v59 = vpop.permute.xlu0 %1514 }
 0x295   : > { %3114 = vst [vmem:[#allocation21_spill] sm:$0xff] %v2878_v59 }
 0x298   : > { %v1525_v18 = vpop.permute.xlu0 %1524 }
 0x29a   : > { %v1938_v61 = vpop.eup %1937 }
 0x29b   : > { %v1240_v4 = vmul.f32 %v1938_v61, %v1165_v21 }
 0x29c   : > { %v1535_v14 = vpop.permute.xlu0 %1534 }
 0x29d   : > { %1319 = vperm.xlu0 %1849, %v1240_v4  }
 0x2a0   : > { %v2886_v36 = vpop.permute.xlu0 %1544 }
 0x2a1   : > { %1574 = vperm.xlu0 %1849, %v1451_v9  }
 0x2a4   : > { %v2888_v35 = vpop.permute.xlu0 %1554 }
 0x2a8   : > { %v2892_v42 = vpop.permute.xlu0 %1564 }
 0x2b7   : > { %v1255_v29 = vpop.permute.xlu0 %1254 }
 0x2b8   : > { %v1377_v53 = vmul.f32 %v1255_v29, %v2554_v43  ;;  %v1378_v44 = vmul.f32 %v1255_v29, %v3116_v20 }
 0x2ba   : > { %v1577_v12 = vadd.f32 %v3117_v52, %v1377_v53  ;;  %v1578_v21 = vadd.f32 %v3117_v52, %v1378_v44  ;;  %v3118_v52 = vld [vmem:[#allocation3_spill] sm:$0xff] }
 0x2bc   : > { %v1325_v61 = vpop.permute.xlu1 %1324  ;;  %1627 = vst [vmem:[%s2902_s30] sm:$0xff] %v1577_v12  ;;  %1628 = vst.msk [vmem:[%s2902_s30 + $0x8] sm:$0xff] %vm801_vm2, %v1578_v21 }
 0x2bd   : > { %v1405_v43 = vmul.f32 %v1325_v61, %v2564_v25  ;;  %v1406_v4 = vmul.f32 %v1325_v61, %v2567_v37 }
 0x2bf   : > { %v1605_v9 = vadd.f32 %v1525_v18, %v1405_v43  ;;  %v1606_v29 = vadd.f32 %v1525_v18, %v1406_v4  ;;  %v3119_v18 = vld [vmem:[#allocation12_spill] sm:$0xff]  ;;  %v3120_v43 = vld [vmem:[#allocation11_spill] sm:$0xff] }
 0x2c0   : > { %v1260_v20 = vpop.permute.xlu1 %1259 }
 0x2c1   : > { %1655 = vst [vmem:[%s2902_s30 + $0xe0] sm:$0xff] %v1605_v9  ;;  %1656 = vst.msk [vmem:[%s2902_s30 + $0xe8] sm:$0xff] %vm801_vm2, %v1606_v29  ;;  %v1379_v53 = vmul.f32 %v1260_v20, %v2581_v24  ;;  %v1380_v44 = vmul.f32 %v1260_v20, %v2584_v30  ;;  %v3121_v24 = vld [vmem:[#allocation13_spill] sm:$0xff]  ;;  %v3122_v30 = vld [vmem:[#allocation14_spill] sm:$0xff] }
 0x2c3   : > { %v1579_v12 = vadd.f32 %v3118_v52, %v1379_v53  ;;  %v1580_v21 = vadd.f32 %v3118_v52, %v1380_v44  ;;  %v3123_v44 = vld [vmem:[#allocation4_spill] sm:$0xff] }
 0x2c4   : > { %v1330_v25 = vpop.permute.xlu0 %1329  ;;  %v1265_v37 = vpop.permute.xlu1 %1264 }
 0x2c5   : > { %1629 = vst [vmem:[%s2902_s30 + $0x10] sm:$0xff] %v1579_v12  ;;  %1630 = vst.msk [vmem:[%s2902_s30 + $0x18] sm:$0xff] %vm801_vm2, %v1580_v21  ;;  %v1407_v61 = vmul.f32 %v1330_v25, %v3119_v18  ;;  %v1408_v4 = vmul.f32 %v1330_v25, %v3120_v43  ;;  %v1381_v9 = vmul.f32 %v1265_v37, %v3121_v24 }
 0x2c6   : > { %v1382_v29 = vmul.f32 %v1265_v37, %v3122_v30 }
 0x2c7   : > { %v1607_v20 = vadd.f32 %v1530_v32, %v1407_v61  ;;  %v1608_v53 = vadd.f32 %v1530_v32, %v1408_v4  ;;  %v1581_v52 = vadd.f32 %v3123_v44, %v1381_v9 }
 0x2c8   : > { %v1582_v56 = vadd.f32 %v3123_v44, %v1382_v29  ;;  %v1335_v59 = vpop.permute.xlu1 %1334 }
 0x2c9   : > { %1657 = vst [vmem:[%s2902_s30 + $0xf0] sm:$0xff] %v1607_v20  ;;  %1658 = vst.msk [vmem:[%s2902_s30 + $0xf8] sm:$0xff] %vm801_vm2, %v1608_v53  ;;  %v1409_v12 = vmul.f32 %v1335_v59, %v2604_v16  ;;  %v1410_v21 = vmul.f32 %v1335_v59, %v2607_v0  ;;  %v3124_v16 = vld [vmem:[#allocation15_spill] sm:$0xff] }
 0x2ca   : > { %1631 = vst [vmem:[%s2902_s30 + $0x20] sm:$0xff] %v1581_v52  ;;  %1632 = vst.msk [vmem:[%s2902_s30 + $0x28] sm:$0xff] %vm801_vm2, %v1582_v56 }
 0x2cb   : > { %v1609_v25 = vadd.f32 %v1535_v14, %v1409_v12  ;;  %v1610_v37 = vadd.f32 %v1535_v14, %v1410_v21  ;;  %v3125_v14 = vld [vmem:[#allocation5_spill] sm:$0xff] }
 0x2cc   : > { %v1340_v32 = vpop.permute.xlu0 %1339  ;;  %v1270_v18 = vpop.permute.xlu1 %1269 }
 0x2cd   : > { %1659 = vst [vmem:[%s2902_s30 + $0x100] sm:$0xff] %v1609_v25  ;;  %1660 = vst.msk [vmem:[%s2902_s30 + $0x108] sm:$0xff] %vm801_vm2, %v1610_v37  ;;  %v1411_v61 = vmul.f32 %v1340_v32, %v2636_v13  ;;  %v1412_v43 = vmul.f32 %v1340_v32, %v2627_v26  ;;  %v1383_v56 = vmul.f32 %v1270_v18, %v2615_v19  ;;  %v3126_v13 = vld [vmem:[#allocation6_spill] sm:$0xff] }
 0x2ce   : > { %v1384_v4 = vmul.f32 %v1270_v18, %v3124_v16 }
 0x2cf   : > { %v1611_v0 = vadd.f32 %v1540_v60, %v1411_v61  ;;  %v1612_v59 = vadd.f32 %v1540_v60, %v1412_v43  ;;  %v1583_v24 = vadd.f32 %v3125_v14, %v1383_v56 }
 0x2d0   : > { %v1584_v9 = vadd.f32 %v3125_v14, %v1384_v4  ;;  %v1275_v30 = vpop.permute.xlu1 %1274  ;;  %v3128_v4 = vld [vmem:[#allocation8_spill] sm:$0xff] }
 0x2d1   : > { %1661 = vst [vmem:[%s2902_s30 + $0x110] sm:$0xff] %v1611_v0  ;;  %1662 = vst.msk [vmem:[%s2902_s30 + $0x118] sm:$0xff] %vm801_vm2, %v1612_v59  ;;  %v1385_v26 = vmul.f32 %v1275_v30, %v2630_v33  ;;  %v1386_v19 = vmul.f32 %v1275_v30, %v2633_v8 }
 0x2d2   : > { %1633 = vst [vmem:[%s2902_s30 + $0x30] sm:$0xff] %v1583_v24  ;;  %1634 = vst.msk [vmem:[%s2902_s30 + $0x38] sm:$0xff] %vm801_vm2, %v1584_v9 }
 0x2d3   : > { %v1585_v29 = vadd.f32 %v3126_v13, %v1385_v26  ;;  %v1586_v60 = vadd.f32 %v3126_v13, %v1386_v19 }
 0x2d4   : > { %v1350_v20 = vpop.permute.xlu0 %1349  ;;  %v1345_v53 = vpop.permute.xlu1 %1344 }
 0x2d5   : > { %1635 = vst [vmem:[%s2902_s30 + $0x40] sm:$0xff] %v1585_v29  ;;  %1636 = vst.msk [vmem:[%s2902_s30 + $0x48] sm:$0xff] %vm801_vm2, %v1586_v60  ;;  %v1415_v44 = vmul.f32 %v1350_v20, %v2680_v34  ;;  %v1416_v52 = vmul.f32 %v1350_v20, %v2671_v3  ;;  %v1413_v33 = vmul.f32 %v1345_v53, %v2649_v11  ;;  %v3127_v3 = vld [vmem:[#allocation7_spill] sm:$0xff] }
 0x2d6   : > { %v1414_v8 = vmul.f32 %v1345_v53, %v2652_v48 }
 0x2d7   : > { %v1615_v12 = vadd.f32 %v2890_v15, %v1415_v44  ;;  %v1616_v21 = vadd.f32 %v2890_v15, %v1416_v52  ;;  %v1613_v25 = vadd.f32 %v2886_v36, %v1413_v33 }
 0x2d8   : > { %v1614_v37 = vadd.f32 %v2886_v36, %v1414_v8  ;;  %v1280_v32 = vpop.permute.xlu1 %1279 }
 0x2d9   : > { %1665 = vst [vmem:[%s2902_s30 + $0x130] sm:$0xff] %v1615_v12  ;;  %1666 = vst.msk [vmem:[%s2902_s30 + $0x138] sm:$0xff] %vm801_vm2, %v1616_v21  ;;  %v1387_v11 = vmul.f32 %v1280_v32, %v2658_v38  ;;  %v1388_v48 = vmul.f32 %v1280_v32, %v2655_v22  ;;  %v3130_v32 = vld [vmem:[#allocation16_spill] sm:$0xff] }
 0x2da   : > { %1663 = vst [vmem:[%s2902_s30 + $0x120] sm:$0xff] %v1613_v25  ;;  %1664 = vst.msk [vmem:[%s2902_s30 + $0x128] sm:$0xff] %vm801_vm2, %v1614_v37 }
 0x2db   : > { %v1587_v34 = vadd.f32 %v3127_v3, %v1387_v11  ;;  %v1588_v15 = vadd.f32 %v3127_v3, %v1388_v48 }
 0x2dc   : > { %v1360_v18 = vpop.permute.xlu0 %1359  ;;  %v1285_v36 = vpop.permute.xlu1 %1284 }
 0x2dd   : > { %1637 = vst [vmem:[%s2902_s30 + $0x50] sm:$0xff] %v1587_v34  ;;  %1638 = vst.msk [vmem:[%s2902_s30 + $0x58] sm:$0xff] %vm801_vm2, %v1588_v15  ;;  %v1419_v61 = vmul.f32 %v1360_v18, %v2724_v1  ;;  %v1420_v43 = vmul.f32 %v1360_v18, %v2715_v62  ;;  %v1389_v38 = vmul.f32 %v1285_v36, %v2674_v46  ;;  %v3133_v18 = vld [vmem:[#allocation20_spill] sm:$0xff] }
 0x2de   : > { %v1390_v22 = vmul.f32 %v1285_v36, %v2677_v27 }
 0x2df   : > { %v1619_v56 = vadd.f32 %v2895_v51, %v1419_v61  ;;  %v1620_v16 = vadd.f32 %v2895_v51, %v1420_v43  ;;  %v1589_v0 = vadd.f32 %v3128_v4, %v1389_v38  ;;  %v3134_v61 = vld [vmem:[#allocation17_spill] sm:$0xff]  ;;  %v3135_v38 = vld [vmem:[#allocation18_spill] sm:$0xff] }
 0x2e0   : > { %v1590_v59 = vadd.f32 %v3128_v4, %v1390_v22  ;;  %v1300_v14 = vpop.permute.xlu0 %1299  ;;  %v1355_v24 = vpop.permute.xlu1 %1354 }
 0x2e1   : > { %1669 = vst [vmem:[%s2902_s30 + $0x150] sm:$0xff] %v1619_v56  ;;  %1670 = vst.msk [vmem:[%s2902_s30 + $0x158] sm:$0xff] %vm801_vm2, %v1620_v16  ;;  %v1395_v46 = vmul.f32 %v1300_v14, %v2746_v6  ;;  %v1396_v27 = vmul.f32 %v1300_v14, %v2743_v55  ;;  %v1417_v62 = vmul.f32 %v1355_v24, %v2693_v50  ;;  %v3129_v55 = vld [vmem:[#allocation9_spill] sm:$0xff]  ;;  %v3136_v56 = vld [vmem:[#allocation22_spill] sm:$0xff] }
 0x2e2   : > { %1639 = vst [vmem:[%s2902_s30 + $0x60] sm:$0xff] %v1589_v0  ;;  %1640 = vst.msk [vmem:[%s2902_s30 + $0x68] sm:$0xff] %vm801_vm2, %v1590_v59  ;;  %v1418_v1 = vmul.f32 %v1355_v24, %v2696_v31 }
 0x2e3   : > { %v1595_v51 = vadd.f32 %v2822_v5, %v1395_v46  ;;  %v1596_v9 = vadd.f32 %v2822_v5, %v1396_v27  ;;  %v1617_v30 = vadd.f32 %v2888_v35, %v1417_v62 }
 0x2e4   : > { %v1618_v26 = vadd.f32 %v2888_v35, %v1418_v1  ;;  %v1370_v19 = vpop.permute.xlu0 %1369  ;;  %v1290_v13 = vpop.permute.xlu1 %1289 }
 0x2e5   : > { %1645 = vst [vmem:[%s2902_s30 + $0x90] sm:$0xff] %v1595_v51  ;;  %1646 = vst.msk [vmem:[%s2902_s30 + $0x98] sm:$0xff] %vm801_vm2, %v1596_v9  ;;  %v1391_v50 = vmul.f32 %v1290_v13, %v2702_v54  ;;  %v1392_v31 = vmul.f32 %v1290_v13, %v2699_v39  ;;  %v1424_v11 = vmul.f32 %v1370_v19, %v3130_v32 }
 0x2e6   : > { %1667 = vst [vmem:[%s2902_s30 + $0x140] sm:$0xff] %v1617_v30  ;;  %1668 = vst.msk [vmem:[%s2902_s30 + $0x148] sm:$0xff] %vm801_vm2, %v1618_v26 }
 0x2e7   : > { %v1591_v6 = vadd.f32 %v3129_v55, %v1391_v50  ;;  %v1592_v5 = vadd.f32 %v3129_v55, %v1392_v31 }
 0x2e8   : > { %v1310_v35 = vpop.permute.xlu0 %1309  ;;  %v1295_v29 = vpop.permute.xlu1 %1294 }
 0x2e9   : > { %1641 = vst [vmem:[%s2902_s30 + $0x70] sm:$0xff] %v1591_v6  ;;  %1642 = vst.msk [vmem:[%s2902_s30 + $0x78] sm:$0xff] %vm801_vm2, %v1592_v5  ;;  %v1399_v60 = vmul.f32 %v1310_v35, %v2790_v28  ;;  %v1400_v20 = vmul.f32 %v1310_v35, %v2787_v7  ;;  %v1393_v54 = vmul.f32 %v1295_v29, %v2718_v40 }
 0x2ea   : > { %v1394_v39 = vmul.f32 %v1295_v29, %v2721_v47 }
 0x2eb   : > { %v1599_v53 = vadd.f32 %v2881_v45, %v1399_v60  ;;  %v1600_v44 = vadd.f32 %v2881_v45, %v1400_v20  ;;  %v1593_v52 = vadd.f32 %v2843_v58, %v1393_v54 }
 0x2ec   : > { %v1594_v33 = vadd.f32 %v2843_v58, %v1394_v39  ;;  %v1365_v8 = vpop.permute.xlu1 %1364 }
 0x2ed   : > { %1649 = vst [vmem:[%s2902_s30 + $0xb0] sm:$0xff] %v1599_v53  ;;  %1650 = vst.msk [vmem:[%s2902_s30 + $0xb8] sm:$0xff] %vm801_vm2, %v1600_v44  ;;  %v1421_v40 = vmul.f32 %v1365_v8, %v2737_v2  ;;  %v1422_v47 = vmul.f32 %v1365_v8, %v2740_v49 }
 0x2ee   : > { %1643 = vst [vmem:[%s2902_s30 + $0x80] sm:$0xff] %v1593_v52  ;;  %1644 = vst.msk [vmem:[%s2902_s30 + $0x88] sm:$0xff] %vm801_vm2, %v1594_v33 }
 0x2ef   : > { %v1621_v7 = vadd.f32 %v2892_v42, %v1421_v40  ;;  %v1622_v28 = vadd.f32 %v2892_v42, %v1422_v47 }
 0x2f0   : > { %v1305_v45 = vpop.permute.xlu1 %1304 }
 0x2f1   : > { %1671 = vst [vmem:[%s2902_s30 + $0x160] sm:$0xff] %v1621_v7  ;;  %1672 = vst.msk [vmem:[%s2902_s30 + $0x168] sm:$0xff] %vm801_vm2, %v1622_v28  ;;  %v1397_v58 = vmul.f32 %v1305_v45, %v2762_v23  ;;  %v1398_v12 = vmul.f32 %v1305_v45, %v2765_v63  ;;  %v1423_v23 = vmul.f32 %v1370_v19, %v2768_v17  ;;  %v3131_v63 = vld [vmem:[#allocation21_spill] sm:$0xff] }
 0x2f3   : > { %v1597_v21 = vadd.f32 %v2876_v41, %v1397_v58  ;;  %v1598_v2 = vadd.f32 %v2876_v41, %v1398_v12 }
 0x2f4   : > { %v1375_v49 = vpop.permute.xlu1 %1374 }
 0x2f5   : > { %1647 = vst [vmem:[%s2902_s30 + $0xa0] sm:$0xff] %v1597_v21  ;;  %1648 = vst.msk [vmem:[%s2902_s30 + $0xa8] sm:$0xff] %vm801_vm2, %v1598_v2  ;;  %v1425_v43 = vmul.f32 %v1375_v49, %v3134_v61  ;;  %v1426_v22 = vmul.f32 %v1375_v49, %v3135_v38 }
 0x2f8   : > { %v1315_v42 = vpop.permute.xlu1 %1314 }
 0x2f9   : > { %v1401_v25 = vmul.f32 %v1315_v42, %v2803_v10  ;;  %v1402_v37 = vmul.f32 %v1315_v42, %v2806_v57  ;;  %v3132_v10 = vld [vmem:[#allocation19_spill] sm:$0xff] }
 0x2fb   : > { %v1601_v48 = vadd.f32 %v3131_v63, %v1401_v25  ;;  %v1602_v3 = vadd.f32 %v3131_v63, %v1402_v37 }
 0x2fc   : > { %v1570_v41 = vpop.permute.xlu1 %1569 }
 0x2fd   : > { %1651 = vst [vmem:[%s2902_s30 + $0xc0] sm:$0xff] %v1601_v48  ;;  %1652 = vst.msk [vmem:[%s2902_s30 + $0xc8] sm:$0xff] %vm801_vm2, %v1602_v3  ;;  %v1623_v34 = vadd.f32 %v1570_v41, %v1423_v23  ;;  %v1624_v15 = vadd.f32 %v1570_v41, %v1424_v11 }
 0x2ff   : > { %1673 = vst [vmem:[%s2902_s30 + $0x170] sm:$0xff] %v1623_v34  ;;  %1674 = vst.msk [vmem:[%s2902_s30 + $0x178] sm:$0xff] %vm801_vm2, %v1624_v15 }
 0x318   : > { %v1320_v17 = vpop.permute.xlu0 %1319 }
 0x319   : > { %v1403_v57 = vmul.f32 %v1320_v17, %v3132_v10  ;;  %v1404_v36 = vmul.f32 %v1320_v17, %v3133_v18 }
 0x31b   : > { %v1603_v16 = vadd.f32 %v3136_v56, %v1403_v57  ;;  %v1604_v4 = vadd.f32 %v3136_v56, %v1404_v36 }
 0x31c   : > { %v1575_v0 = vpop.permute.xlu0 %1574 }
 0x31d   : > { %1653 = vst [vmem:[%s2902_s30 + $0xd0] sm:$0xff] %v1603_v16  ;;  %1654 = vst.msk [vmem:[%s2902_s30 + $0xd8] sm:$0xff] %vm801_vm2, %v1604_v4  ;;  %v1625_v59 = vadd.f32 %v1575_v0, %v1425_v43  ;;  %v1626_v14 = vadd.f32 %v1575_v0, %v1426_v22 }
 0x31f   : > { %1675 = vst [vmem:[%s2902_s30 + $0x180] sm:$0xff] %v1625_v59  ;;  %1676 = vst.msk [vmem:[%s2902_s30 + $0x188] sm:$0xff] %vm801_vm2, %v1626_v14 }
 0x320 PF: > { %s15_s18 = sadd.s32 1, %s1945_s18  }
 0x321   : > { %p12_p4 = scmp.ge.s32.totalorder %s15_s18, 8  }
 0x323   :  { %14 = sbr.rel (!%p12_p4) target bundleno = 1 (0x1), region = 76 }

</bundles_post_ra>
